<compile_context>
chip_gen: v7x
topology: tpu7x:2x2x1
jax: 0.10.0
libtpu: 0.0.40
codegen_flags: <defaults>
</compile_context>

<pallas_src>
import numpy as np
import jax
import jax.numpy as jnp
from jax.experimental import pallas as pl
from jax.experimental.pallas import tpu as pltpu

# Small synthetic problem size (n_feat = 8, kernel_size = 3).
N, C, H, W = 2, 8, 16, 16
KS = 3
RES_SCALE = 1.0
NH = N * H        # 32  rows (sublane axis)
WC = W * C        # 128 lanes (lane axis) -> lane-dense


def rcab_kernel(x_ref,
                c1p_ref, c1c_ref, c1n_ref, b1_ref,
                c2p_ref, c2c_ref, c2n_ref, b2_ref,
                wd1_ref, bd1_ref, wd2_ref, bd2_ref,
                wd3_ref, bd3_ref, wd4_ref, bd4_ref,
                poolA_ref, chanS_ref, bcastB_ref, chanT_ref,
                o_ref):
    x = x_ref[...]                                            # (NH, WC) = (32, 128)

    # Per-image row masks for the vertical (ky) shifts.  Rows are n*H + y, so
    # masking on row % H kills both the zero-padding rows and cross-image
    # leakage from the wrap-around of the circular roll.
    row = jax.lax.broadcasted_iota(jnp.int32, (NH, WC), 0)
    rin = row % H
    top_mask = (rin != 0).astype(jnp.float32)                 # for z[row-1]
    bot_mask = (rin != H - 1).astype(jnp.float32)             # for z[row+1]

    def conv3x3(z, mp_ref, mc_ref, mn_ref, b_ref):
        # z[row-1] / z[row+1] with zero padding at each image's top/bottom.
        # pltpu.roll requires non-negative shifts: shift by NH-1 == shift by -1.
        z_prev = pltpu.roll(z, shift=1, axis=0) * top_mask
        z_next = pltpu.roll(z, shift=NH - 1, axis=0) * bot_mask
        acc = jnp.dot(z_prev, mp_ref[...], preferred_element_type=jnp.float32)
        acc = acc + jnp.dot(z, mc_ref[...], preferred_element_type=jnp.float32)
        acc = acc + jnp.dot(z_next, mn_ref[...], preferred_element_type=jnp.float32)
        return acc + b_ref[...]                               # bias tiled to (1, WC)

    # body: conv -> ReLU -> conv
    h = jnp.maximum(conv3x3(x, c1p_ref, c1c_ref, c1n_ref, b1_ref), 0.0)
    r = conv3x3(h, c2p_ref, c2c_ref, c2n_ref, b2_ref)         # (NH, WC)

    # CALayer: global average pool -> 4x (1x1 conv == matmul) -> softmax(C)
    t = jnp.dot(poolA_ref[...], r, preferred_element_type=jnp.float32)   # (N, WC), 1/(H*W) baked in
    y = jnp.dot(t, chanS_ref[...], preferred_element_type=jnp.float32)   # (N, C) pooled means
    y = jnp.maximum(jnp.dot(y, wd1_ref[...], preferred_element_type=jnp.float32) + bd1_ref[...], 0.0)
    y = jnp.maximum(jnp.dot(y, wd2_ref[...], preferred_element_type=jnp.float32) + bd2_ref[...], 0.0)
    y = jnp.maximum(jnp.dot(y, wd3_ref[...], preferred_element_type=jnp.float32) + bd3_ref[...], 0.0)
    y = jnp.dot(y, wd4_ref[...], preferred_element_type=jnp.float32) + bd4_ref[...]
    m = jnp.max(y, axis=-1, keepdims=True)                    # softmax over channels
    e = jnp.exp(y - m)
    y = e / jnp.sum(e, axis=-1, keepdims=True)

    # Broadcast the (N, C) channel attention back to the lane-dense tile.
    scale_rows = jnp.dot(y, chanT_ref[...], preferred_element_type=jnp.float32)       # (N, WC)
    scale = jnp.dot(bcastB_ref[...], scale_rows, preferred_element_type=jnp.float32)  # (NH, WC)

    o_ref[...] = r * scale * RES_SCALE + x


def _band_matrices(w_hwio):
    """Fold (kx, ci, co) of a 3x3 HWIO weight into 3 banded (W*C, W*C) matrices (one per ky)."""
    w = np.asarray(w_hwio, dtype=np.float32)                  # (3, 3, C, C)
    mats = []
    for ky in range(KS):
        M = np.zeros((W, C, W, C), np.float32)
        for kx in range(KS):
            d = kx - 1                                        # xin = xout + d
            for xo in range(W):
                xi = xo + d
                if 0 <= xi < W:
                    M[xi, :, xo, :] = w[ky, kx]
        mats.append(jnp.asarray(M.reshape(WC, WC)))
    return mats


def _constant_mats():
    poolA = np.zeros((N, NH), np.float32)                     # per-image row sum, mean-scaled
    for n in range(N):
        poolA[n, n * H:(n + 1) * H] = 1.0 / (H * W)
    chanS = np.zeros((WC, C), np.float32)                     # lane -> channel reduction
    for l in range(WC):
        chanS[l, l % C] = 1.0
    bcastB = np.zeros((NH, N), np.float32)                    # image -> rows broadcast
    for r_ in range(NH):
        bcastB[r_, r_ // H] = 1.0
    chanT = chanS.T.copy()                                    # channel -> lanes broadcast
    return (jnp.asarray(poolA), jnp.asarray(chanS),
            jnp.asarray(bcastB), jnp.asarray(chanT))


def rcab_pallas_nhwc(x_nhwc, params):
    (w1, b1, w2, b2, wd1, bd1, wd2, bd2, wd3, bd3, wd4, bd4) = params

    c1p, c1c, c1n = _band_matrices(w1)
    c2p, c2c, c2n = _band_matrices(w2)
    b1t = jnp.tile(b1.astype(jnp.float32), (1, W))            # (1, WC), lane l -> bias[l % C]
    b2t = jnp.tile(b2.astype(jnp.float32), (1, W))
    poolA, chanS, bcastB, chanT = _constant_mats()

    x_packed = x_nhwc.reshape(NH, WC)                         # (W, C) -> lanes, (N, H) -> sublanes

    def full(a):
        nd = a.ndim
        return pl.BlockSpec(a.shape, lambda i, nd=nd: (0,) * nd)

    inputs = (x_packed,
              c1p, c1c, c1n, b1t,
              c2p, c2c, c2n, b2t,
              wd1, bd1, wd2, bd2, wd3, bd3, wd4, bd4,
              poolA, chanS, bcastB, chanT)

    out = pl.pallas_call(
        rcab_kernel,
        out_shape=jax.ShapeDtypeStruct((NH, WC), jnp.float32),
        grid_spec=pltpu.PrefetchScalarGridSpec(
            num_scalar_prefetch=0,
            grid=(1,),                                        # single step: whole batch at once
            in_specs=[full(a) for a in inputs],
            out_specs=pl.BlockSpec((NH, WC), lambda i: (0, 0)),
        ),
        compiler_params=pltpu.CompilerParams(
            dimension_semantics=("arbitrary",)),
    )(*inputs)
    return out.reshape(N, H, W, C)


def rcab_forward(x_nchw, params):
    """PyTorch-facing entry point: NCHW in, NCHW out."""
    x_nhwc = jnp.transpose(x_nchw, (0, 2, 3, 1))
    out = rcab_pallas_nhwc(x_nhwc, params)
    return jnp.transpose(out, (0, 3, 1, 2))


def rcab_reference(x_nchw, params):
    """Pure-JAX reference (NCHW in / out) for correctness checking."""
    (w1, b1, w2, b2, wd1, bd1, wd2, bd2, wd3, bd3, wd4, bd4) = params
    x = jnp.transpose(x_nchw, (0, 2, 3, 1))
    dn = ('NHWC', 'HWIO', 'NHWC')
    h = jax.lax.conv_general_dilated(x, w1, (1, 1), 'SAME', dimension_numbers=dn) + b1
    h = jnp.maximum(h, 0.0)
    r = jax.lax.conv_general_dilated(h, w2, (1, 1), 'SAME', dimension_numbers=dn) + b2
    y = jnp.mean(r, axis=(1, 2))                              # (N, C)
    y = jnp.maximum(y @ wd1 + bd1, 0.0)
    y = jnp.maximum(y @ wd2 + bd2, 0.0)
    y = jnp.maximum(y @ wd3 + bd3, 0.0)
    y = y @ wd4 + bd4
    y = jax.nn.softmax(y, axis=-1)
    out = r * y[:, None, None, :] * RES_SCALE + x
    return jnp.transpose(out, (0, 3, 1, 2))


if __name__ == "__main__":
    key = jax.random.PRNGKey(0)
    ks = jax.random.split(key, 13)

    def mk(k, shape, scale=0.1):
        return (scale * jax.random.normal(k, shape)).astype(jnp.float32)

    # PyTorch-style NCHW input
    x = jax.random.normal(ks[0], (N, C, H, W), jnp.float32)

    params = (
        mk(ks[1], (KS, KS, C, C)), mk(ks[2], (1, C)),         # conv1 (3x3)
        mk(ks[3], (KS, KS, C, C)), mk(ks[4], (1, C)),         # conv2 (3x3)
        mk(ks[5], (C, C)), mk(ks[6], (1, C)),                 # CA 1x1 conv #1
        mk(ks[7], (C, C)), mk(ks[8], (1, C)),                 # CA 1x1 conv #2
        mk(ks[9], (C, C)), mk(ks[10], (1, C)),                # CA 1x1 conv #3
        mk(ks[11], (C, C)), mk(ks[12], (1, C)),               # CA 1x1 conv #4
    )

    out = jax.block_until_ready(rcab_forward(x, params))
    ref = rcab_reference(x, params)

    assert out.shape == (N, C, H, W)
    max_err = float(jnp.max(jnp.abs(out - ref)))
    assert max_err < 1e-4, f"mismatch vs reference: {max_err}"
    print("KERNEL_OK")
</pallas_src>

<mosaic_0001>
module attributes {stable_mosaic.version = 11 : i64} {
  func.func @rcab_kernel(%arg0: i32, %arg1: memref<32x128xf32, #tpu.memory_space<vmem>>, %arg2: memref<128x128xf32, #tpu.memory_space<vmem>>, %arg3: memref<128x128xf32, #tpu.memory_space<vmem>>, %arg4: memref<128x128xf32, #tpu.memory_space<vmem>>, %arg5: memref<1x128xf32, #tpu.memory_space<vmem>>, %arg6: memref<128x128xf32, #tpu.memory_space<vmem>>, %arg7: memref<128x128xf32, #tpu.memory_space<vmem>>, %arg8: memref<128x128xf32, #tpu.memory_space<vmem>>, %arg9: memref<1x128xf32, #tpu.memory_space<vmem>>, %arg10: memref<8x8xf32, #tpu.memory_space<vmem>>, %arg11: memref<1x8xf32, #tpu.memory_space<vmem>>, %arg12: memref<8x8xf32, #tpu.memory_space<vmem>>, %arg13: memref<1x8xf32, #tpu.memory_space<vmem>>, %arg14: memref<8x8xf32, #tpu.memory_space<vmem>>, %arg15: memref<1x8xf32, #tpu.memory_space<vmem>>, %arg16: memref<8x8xf32, #tpu.memory_space<vmem>>, %arg17: memref<1x8xf32, #tpu.memory_space<vmem>>, %arg18: memref<2x32xf32, #tpu.memory_space<vmem>>, %arg19: memref<128x8xf32, #tpu.memory_space<vmem>>, %arg20: memref<32x2xf32, #tpu.memory_space<vmem>>, %arg21: memref<8x128xf32, #tpu.memory_space<vmem>>, %arg22: memref<32x128xf32, #tpu.memory_space<vmem>>) attributes {dimension_semantics = [#tpu.dimension_semantics<arbitrary>], iteration_bounds = array<i64: 1>, scalar_prefetch = 0 : i64, scratch_operands = 0 : i64, tpu.core_type = #tpu.core_type<tc>, window_params = [{pipeline_mode = #tpu.pipeline_mode<synchronous>, transform_indices = @transform_0, window_bounds = array<i64: 32, 128>}, {pipeline_mode = #tpu.pipeline_mode<synchronous>, transform_indices = @transform_1, window_bounds = array<i64: 128, 128>}, {pipeline_mode = #tpu.pipeline_mode<synchronous>, transform_indices = @transform_2, window_bounds = array<i64: 128, 128>}, {pipeline_mode = #tpu.pipeline_mode<synchronous>, transform_indices = @transform_3, window_bounds = array<i64: 128, 128>}, {pipeline_mode = #tpu.pipeline_mode<synchronous>, transform_indices = @transform_4, window_bounds = array<i64: 1, 128>}, {pipeline_mode = #tpu.pipeline_mode<synchronous>, transform_indices = @transform_5, window_bounds = array<i64: 128, 128>}, {pipeline_mode = #tpu.pipeline_mode<synchronous>, transform_indices = @transform_6, window_bounds = array<i64: 128, 128>}, {pipeline_mode = #tpu.pipeline_mode<synchronous>, transform_indices = @transform_7, window_bounds = array<i64: 128, 128>}, {pipeline_mode = #tpu.pipeline_mode<synchronous>, transform_indices = @transform_8, window_bounds = array<i64: 1, 128>}, {pipeline_mode = #tpu.pipeline_mode<synchronous>, transform_indices = @transform_9, window_bounds = array<i64: 8, 8>}, {pipeline_mode = #tpu.pipeline_mode<synchronous>, transform_indices = @transform_10, window_bounds = array<i64: 1, 8>}, {pipeline_mode = #tpu.pipeline_mode<synchronous>, transform_indices = @transform_11, window_bounds = array<i64: 8, 8>}, {pipeline_mode = #tpu.pipeline_mode<synchronous>, transform_indices = @transform_12, window_bounds = array<i64: 1, 8>}, {pipeline_mode = #tpu.pipeline_mode<synchronous>, transform_indices = @transform_13, window_bounds = array<i64: 8, 8>}, {pipeline_mode = #tpu.pipeline_mode<synchronous>, transform_indices = @transform_14, window_bounds = array<i64: 1, 8>}, {pipeline_mode = #tpu.pipeline_mode<synchronous>, transform_indices = @transform_15, window_bounds = array<i64: 8, 8>}, {pipeline_mode = #tpu.pipeline_mode<synchronous>, transform_indices = @transform_16, window_bounds = array<i64: 1, 8>}, {pipeline_mode = #tpu.pipeline_mode<synchronous>, transform_indices = @transform_17, window_bounds = array<i64: 2, 32>}, {pipeline_mode = #tpu.pipeline_mode<synchronous>, transform_indices = @transform_18, window_bounds = array<i64: 128, 8>}, {pipeline_mode = #tpu.pipeline_mode<synchronous>, transform_indices = @transform_19, window_bounds = array<i64: 32, 2>}, {pipeline_mode = #tpu.pipeline_mode<synchronous>, transform_indices = @transform_20, window_bounds = array<i64: 8, 128>}, {pipeline_mode = #tpu.pipeline_mode<synchronous>, transform_indices = @transform_21, window_bounds = array<i64: 32, 128>}]} {
    %c0 = arith.constant 0 : index
    %c0_0 = arith.constant 0 : index
    %0 = vector.load %arg1[%c0, %c0_0] : memref<32x128xf32, #tpu.memory_space<vmem>>, vector<32x128xf32>
    %1 = tpu.iota {dimensions = array<i32: 0>} : vector<32x128xi32>
    %c16_i32 = arith.constant 16 : i32
    %c0_i32 = arith.constant 0 : i32
    %2 = arith.cmpi eq, %c16_i32, %c0_i32 : i32
    %c1_i32 = arith.constant 1 : i32
    %3 = arith.select %2, %c1_i32, %c16_i32 : i32
    %4 = vector.broadcast %3 : i32 to vector<32x128xi32>
    %5 = arith.remsi %1, %4 : vector<32x128xi32>
    %c0_i32_1 = arith.constant 0 : i32
    %6 = vector.broadcast %c0_i32_1 : i32 to vector<32x128xi32>
    %7 = arith.cmpi ne, %5, %6 : vector<32x128xi32>
    %c0_i32_2 = arith.constant 0 : i32
    %8 = vector.broadcast %c0_i32_2 : i32 to vector<32x128xi32>
    %9 = arith.cmpi slt, %5, %8 : vector<32x128xi32>
    %c0_i32_3 = arith.constant 0 : i32
    %10 = arith.cmpi slt, %3, %c0_i32_3 : i32
    %11 = vector.broadcast %10 : i1 to vector<32x128xi1>
    %12 = vector.broadcast %11 : vector<32x128xi1> to vector<32x128xi1>
    %13 = arith.xori %9, %12 : vector<32x128xi1>
    %14 = arith.andi %13, %7 : vector<32x128xi1>
    %15 = vector.broadcast %3 : i32 to vector<32x128xi32>
    %16 = arith.addi %5, %15 : vector<32x128xi32>
    %17 = arith.select %14, %16, %5 : vector<32x128xi1>, vector<32x128xi32>
    %c0_i32_4 = arith.constant 0 : i32
    %18 = vector.broadcast %c0_i32_4 : i32 to vector<32x128xi32>
    %19 = arith.cmpi ne, %17, %18 : vector<32x128xi32>
    %20 = arith.extui %19 : vector<32x128xi1> to vector<32x128xi32>
    %21 = arith.sitofp %20 : vector<32x128xi32> to vector<32x128xf32>
    %c15_i32 = arith.constant 15 : i32
    %22 = vector.broadcast %c15_i32 : i32 to vector<32x128xi32>
    %23 = arith.cmpi ne, %17, %22 : vector<32x128xi32>
    %24 = arith.extui %23 : vector<32x128xi1> to vector<32x128xi32>
    %25 = arith.sitofp %24 : vector<32x128xi32> to vector<32x128xf32>
    %c1_i32_5 = arith.constant 1 : i32
    %26 = tpu.dynamic_rotate %0 by %c1_i32_5 dim 0 : vector<32x128xf32>, i32 -> vector<32x128xf32>
    %27 = arith.mulf %26, %21 : vector<32x128xf32>
    %c31_i32 = arith.constant 31 : i32
    %28 = tpu.dynamic_rotate %0 by %c31_i32 dim 0 : vector<32x128xf32>, i32 -> vector<32x128xf32>
    %29 = arith.mulf %28, %25 : vector<32x128xf32>
    %c0_6 = arith.constant 0 : index
    %c0_7 = arith.constant 0 : index
    %30 = vector.load %arg2[%c0_6, %c0_7] : memref<128x128xf32, #tpu.memory_space<vmem>>, vector<128x128xf32>
    %cst = arith.constant dense<0.000000e+00> : vector<32x128xf32>
    %31 = tpu.matmul %27, %30, %cst {dimension_numbers = #tpu.dot_dimension_numbers<[1], [0], [0], [1], [0, 0, 1, 1], [], []>} : vector<32x128xf32>, vector<128x128xf32>, vector<32x128xf32> -> vector<32x128xf32>
    %c0_8 = arith.constant 0 : index
    %c0_9 = arith.constant 0 : index
    %32 = vector.load %arg3[%c0_8, %c0_9] : memref<128x128xf32, #tpu.memory_space<vmem>>, vector<128x128xf32>
    %cst_10 = arith.constant dense<0.000000e+00> : vector<32x128xf32>
    %33 = tpu.matmul %0, %32, %cst_10 {dimension_numbers = #tpu.dot_dimension_numbers<[1], [0], [0], [1], [0, 0, 1, 1], [], []>} : vector<32x128xf32>, vector<128x128xf32>, vector<32x128xf32> -> vector<32x128xf32>
    %34 = arith.addf %31, %33 : vector<32x128xf32>
    %c0_11 = arith.constant 0 : index
    %c0_12 = arith.constant 0 : index
    %35 = vector.load %arg4[%c0_11, %c0_12] : memref<128x128xf32, #tpu.memory_space<vmem>>, vector<128x128xf32>
    %cst_13 = arith.constant dense<0.000000e+00> : vector<32x128xf32>
    %36 = tpu.matmul %29, %35, %cst_13 {dimension_numbers = #tpu.dot_dimension_numbers<[1], [0], [0], [1], [0, 0, 1, 1], [], []>} : vector<32x128xf32>, vector<128x128xf32>, vector<32x128xf32> -> vector<32x128xf32>
    %37 = arith.addf %34, %36 : vector<32x128xf32>
    %c0_14 = arith.constant 0 : index
    %c0_15 = arith.constant 0 : index
    %38 = vector.load %arg5[%c0_14, %c0_15] : memref<1x128xf32, #tpu.memory_space<vmem>>, vector<1x128xf32>
    %39 = vector.broadcast %38 : vector<1x128xf32> to vector<32x128xf32>
    %40 = arith.addf %37, %39 : vector<32x128xf32>
    %cst_16 = arith.constant 0.000000e+00 : f32
    %41 = vector.broadcast %cst_16 : f32 to vector<32x128xf32>
    %42 = arith.maximumf %40, %41 : vector<32x128xf32>
    %c1_i32_17 = arith.constant 1 : i32
    %43 = tpu.dynamic_rotate %42 by %c1_i32_17 dim 0 : vector<32x128xf32>, i32 -> vector<32x128xf32>
    %44 = arith.mulf %43, %21 : vector<32x128xf32>
    %c31_i32_18 = arith.constant 31 : i32
    %45 = tpu.dynamic_rotate %42 by %c31_i32_18 dim 0 : vector<32x128xf32>, i32 -> vector<32x128xf32>
    %46 = arith.mulf %45, %25 : vector<32x128xf32>
    %c0_19 = arith.constant 0 : index
    %c0_20 = arith.constant 0 : index
    %47 = vector.load %arg6[%c0_19, %c0_20] : memref<128x128xf32, #tpu.memory_space<vmem>>, vector<128x128xf32>
    %cst_21 = arith.constant dense<0.000000e+00> : vector<32x128xf32>
    %48 = tpu.matmul %44, %47, %cst_21 {dimension_numbers = #tpu.dot_dimension_numbers<[1], [0], [0], [1], [0, 0, 1, 1], [], []>} : vector<32x128xf32>, vector<128x128xf32>, vector<32x128xf32> -> vector<32x128xf32>
    %c0_22 = arith.constant 0 : index
    %c0_23 = arith.constant 0 : index
    %49 = vector.load %arg7[%c0_22, %c0_23] : memref<128x128xf32, #tpu.memory_space<vmem>>, vector<128x128xf32>
    %cst_24 = arith.constant dense<0.000000e+00> : vector<32x128xf32>
    %50 = tpu.matmul %42, %49, %cst_24 {dimension_numbers = #tpu.dot_dimension_numbers<[1], [0], [0], [1], [0, 0, 1, 1], [], []>} : vector<32x128xf32>, vector<128x128xf32>, vector<32x128xf32> -> vector<32x128xf32>
    %51 = arith.addf %48, %50 : vector<32x128xf32>
    %c0_25 = arith.constant 0 : index
    %c0_26 = arith.constant 0 : index
    %52 = vector.load %arg8[%c0_25, %c0_26] : memref<128x128xf32, #tpu.memory_space<vmem>>, vector<128x128xf32>
    %cst_27 = arith.constant dense<0.000000e+00> : vector<32x128xf32>
    %53 = tpu.matmul %46, %52, %cst_27 {dimension_numbers = #tpu.dot_dimension_numbers<[1], [0], [0], [1], [0, 0, 1, 1], [], []>} : vector<32x128xf32>, vector<128x128xf32>, vector<32x128xf32> -> vector<32x128xf32>
    %54 = arith.addf %51, %53 : vector<32x128xf32>
    %c0_28 = arith.constant 0 : index
    %c0_29 = arith.constant 0 : index
    %55 = vector.load %arg9[%c0_28, %c0_29] : memref<1x128xf32, #tpu.memory_space<vmem>>, vector<1x128xf32>
    %56 = vector.broadcast %55 : vector<1x128xf32> to vector<32x128xf32>
    %57 = arith.addf %54, %56 : vector<32x128xf32>
    %c0_30 = arith.constant 0 : index
    %c0_31 = arith.constant 0 : index
    %58 = vector.load %arg18[%c0_30, %c0_31] : memref<2x32xf32, #tpu.memory_space<vmem>>, vector<2x32xf32>
    %cst_32 = arith.constant dense<0.000000e+00> : vector<2x128xf32>
    %59 = tpu.matmul %58, %57, %cst_32 {dimension_numbers = #tpu.dot_dimension_numbers<[1], [0], [0], [1], [0, 0, 1, 1], [], []>} : vector<2x32xf32>, vector<32x128xf32>, vector<2x128xf32> -> vector<2x128xf32>
    %c0_33 = arith.constant 0 : index
    %c0_34 = arith.constant 0 : index
    %60 = vector.load %arg19[%c0_33, %c0_34] : memref<128x8xf32, #tpu.memory_space<vmem>>, vector<128x8xf32>
    %cst_35 = arith.constant dense<0.000000e+00> : vector<2x8xf32>
    %61 = tpu.matmul %59, %60, %cst_35 {dimension_numbers = #tpu.dot_dimension_numbers<[1], [0], [0], [1], [0, 0, 1, 1], [], []>} : vector<2x128xf32>, vector<128x8xf32>, vector<2x8xf32> -> vector<2x8xf32>
    %c0_36 = arith.constant 0 : index
    %c0_37 = arith.constant 0 : index
    %62 = vector.load %arg10[%c0_36, %c0_37] : memref<8x8xf32, #tpu.memory_space<vmem>>, vector<8x8xf32>
    %cst_38 = arith.constant dense<0.000000e+00> : vector<2x8xf32>
    %63 = tpu.matmul %61, %62, %cst_38 {dimension_numbers = #tpu.dot_dimension_numbers<[1], [0], [0], [1], [0, 0, 1, 1], [], []>} : vector<2x8xf32>, vector<8x8xf32>, vector<2x8xf32> -> vector<2x8xf32>
    %c0_39 = arith.constant 0 : index
    %c0_40 = arith.constant 0 : index
    %64 = vector.load %arg11[%c0_39, %c0_40] : memref<1x8xf32, #tpu.memory_space<vmem>>, vector<1x8xf32>
    %65 = vector.broadcast %64 : vector<1x8xf32> to vector<2x8xf32>
    %66 = arith.addf %63, %65 : vector<2x8xf32>
    %cst_41 = arith.constant 0.000000e+00 : f32
    %67 = vector.broadcast %cst_41 : f32 to vector<2x8xf32>
    %68 = arith.maximumf %66, %67 : vector<2x8xf32>
    %c0_42 = arith.constant 0 : index
    %c0_43 = arith.constant 0 : index
    %69 = vector.load %arg12[%c0_42, %c0_43] : memref<8x8xf32, #tpu.memory_space<vmem>>, vector<8x8xf32>
    %cst_44 = arith.constant dense<0.000000e+00> : vector<2x8xf32>
    %70 = tpu.matmul %68, %69, %cst_44 {dimension_numbers = #tpu.dot_dimension_numbers<[1], [0], [0], [1], [0, 0, 1, 1], [], []>} : vector<2x8xf32>, vector<8x8xf32>, vector<2x8xf32> -> vector<2x8xf32>
    %c0_45 = arith.constant 0 : index
    %c0_46 = arith.constant 0 : index
    %71 = vector.load %arg13[%c0_45, %c0_46] : memref<1x8xf32, #tpu.memory_space<vmem>>, vector<1x8xf32>
    %72 = vector.broadcast %71 : vector<1x8xf32> to vector<2x8xf32>
    %73 = arith.addf %70, %72 : vector<2x8xf32>
    %cst_47 = arith.constant 0.000000e+00 : f32
    %74 = vector.broadcast %cst_47 : f32 to vector<2x8xf32>
    %75 = arith.maximumf %73, %74 : vector<2x8xf32>
    %c0_48 = arith.constant 0 : index
    %c0_49 = arith.constant 0 : index
    %76 = vector.load %arg14[%c0_48, %c0_49] : memref<8x8xf32, #tpu.memory_space<vmem>>, vector<8x8xf32>
    %cst_50 = arith.constant dense<0.000000e+00> : vector<2x8xf32>
    %77 = tpu.matmul %75, %76, %cst_50 {dimension_numbers = #tpu.dot_dimension_numbers<[1], [0], [0], [1], [0, 0, 1, 1], [], []>} : vector<2x8xf32>, vector<8x8xf32>, vector<2x8xf32> -> vector<2x8xf32>
    %c0_51 = arith.constant 0 : index
    %c0_52 = arith.constant 0 : index
    %78 = vector.load %arg15[%c0_51, %c0_52] : memref<1x8xf32, #tpu.memory_space<vmem>>, vector<1x8xf32>
    %79 = vector.broadcast %78 : vector<1x8xf32> to vector<2x8xf32>
    %80 = arith.addf %77, %79 : vector<2x8xf32>
    %cst_53 = arith.constant 0.000000e+00 : f32
    %81 = vector.broadcast %cst_53 : f32 to vector<2x8xf32>
    %82 = arith.maximumf %80, %81 : vector<2x8xf32>
    %c0_54 = arith.constant 0 : index
    %c0_55 = arith.constant 0 : index
    %83 = vector.load %arg16[%c0_54, %c0_55] : memref<8x8xf32, #tpu.memory_space<vmem>>, vector<8x8xf32>
    %cst_56 = arith.constant dense<0.000000e+00> : vector<2x8xf32>
    %84 = tpu.matmul %82, %83, %cst_56 {dimension_numbers = #tpu.dot_dimension_numbers<[1], [0], [0], [1], [0, 0, 1, 1], [], []>} : vector<2x8xf32>, vector<8x8xf32>, vector<2x8xf32> -> vector<2x8xf32>
    %c0_57 = arith.constant 0 : index
    %c0_58 = arith.constant 0 : index
    %85 = vector.load %arg17[%c0_57, %c0_58] : memref<1x8xf32, #tpu.memory_space<vmem>>, vector<1x8xf32>
    %86 = vector.broadcast %85 : vector<1x8xf32> to vector<2x8xf32>
    %87 = arith.addf %84, %86 : vector<2x8xf32>
    %cst_59 = arith.constant dense<0xFF800000> : vector<2xf32>
    %88 = vector.multi_reduction <maximumf>, %87, %cst_59 [1] : vector<2x8xf32> to vector<2xf32>
    %89 = vector.shape_cast %88 : vector<2xf32> to vector<2x1xf32>
    %90 = vector.broadcast %89 : vector<2x1xf32> to vector<2x8xf32>
    %91 = arith.subf %87, %90 : vector<2x8xf32>
    %92 = math.exp %91 : vector<2x8xf32>
    %cst_60 = arith.constant dense<0.000000e+00> : vector<2xf32>
    %93 = vector.multi_reduction <add>, %92, %cst_60 [1] : vector<2x8xf32> to vector<2xf32>
    %94 = vector.shape_cast %93 : vector<2xf32> to vector<2x1xf32>
    %95 = vector.broadcast %94 : vector<2x1xf32> to vector<2x8xf32>
    %96 = arith.divf %92, %95 : vector<2x8xf32>
    %c0_61 = arith.constant 0 : index
    %c0_62 = arith.constant 0 : index
    %97 = vector.load %arg21[%c0_61, %c0_62] : memref<8x128xf32, #tpu.memory_space<vmem>>, vector<8x128xf32>
    %cst_63 = arith.constant dense<0.000000e+00> : vector<2x128xf32>
    %98 = tpu.matmul %96, %97, %cst_63 {dimension_numbers = #tpu.dot_dimension_numbers<[1], [0], [0], [1], [0, 0, 1, 1], [], []>} : vector<2x8xf32>, vector<8x128xf32>, vector<2x128xf32> -> vector<2x128xf32>
    %c0_64 = arith.constant 0 : index
    %c0_65 = arith.constant 0 : index
    %99 = vector.load %arg20[%c0_64, %c0_65] : memref<32x2xf32, #tpu.memory_space<vmem>>, vector<32x2xf32>
    %cst_66 = arith.constant dense<0.000000e+00> : vector<32x128xf32>
    %100 = tpu.matmul %99, %98, %cst_66 {dimension_numbers = #tpu.dot_dimension_numbers<[1], [0], [0], [1], [0, 0, 1, 1], [], []>} : vector<32x2xf32>, vector<2x128xf32>, vector<32x128xf32> -> vector<32x128xf32>
    %101 = arith.mulf %57, %100 : vector<32x128xf32>
    %cst_67 = arith.constant 1.000000e+00 : f32
    %102 = vector.broadcast %cst_67 : f32 to vector<32x128xf32>
    %103 = arith.mulf %101, %102 : vector<32x128xf32>
    %104 = arith.addf %103, %0 : vector<32x128xf32>
    %c0_68 = arith.constant 0 : index
    %c0_69 = arith.constant 0 : index
    %105 = vector.load %arg22[%c0_68, %c0_69] : memref<32x128xf32, #tpu.memory_space<vmem>>, vector<32x128xf32>
    tpu.vector_store %arg22[%c0_68, %c0_69], %104 {strides = array<i32>} : memref<32x128xf32, #tpu.memory_space<vmem>>, vector<32x128xf32>,
    return
  }
  func.func @transform_0(%arg0: i32) -> (i32, i32) {
    %c0_i32 = arith.constant 0 : i32
    %c0_i32_0 = arith.constant 0 : i32
    %c0_i32_1 = arith.constant 0 : i32
    return %c0_i32, %c0_i32_0 : i32, i32
  }
  func.func @transform_1(%arg0: i32) -> (i32, i32) {
    %c0_i32 = arith.constant 0 : i32
    %c0_i32_0 = arith.constant 0 : i32
    %c0_i32_1 = arith.constant 0 : i32
    return %c0_i32, %c0_i32_0 : i32, i32
  }
  func.func @transform_2(%arg0: i32) -> (i32, i32) {
    %c0_i32 = arith.constant 0 : i32
    %c0_i32_0 = arith.constant 0 : i32
    %c0_i32_1 = arith.constant 0 : i32
    return %c0_i32, %c0_i32_0 : i32, i32
  }
  func.func @transform_3(%arg0: i32) -> (i32, i32) {
    %c0_i32 = arith.constant 0 : i32
    %c0_i32_0 = arith.constant 0 : i32
    %c0_i32_1 = arith.constant 0 : i32
    return %c0_i32, %c0_i32_0 : i32, i32
  }
  func.func @transform_4(%arg0: i32) -> (i32, i32) {
    %c0_i32 = arith.constant 0 : i32
    %c0_i32_0 = arith.constant 0 : i32
    %c0_i32_1 = arith.constant 0 : i32
    return %c0_i32, %c0_i32_0 : i32, i32
  }
  func.func @transform_5(%arg0: i32) -> (i32, i32) {
    %c0_i32 = arith.constant 0 : i32
    %c0_i32_0 = arith.constant 0 : i32
    %c0_i32_1 = arith.constant 0 : i32
    return %c0_i32, %c0_i32_0 : i32, i32
  }
  func.func @transform_6(%arg0: i32) -> (i32, i32) {
    %c0_i32 = arith.constant 0 : i32
    %c0_i32_0 = arith.constant 0 : i32
    %c0_i32_1 = arith.constant 0 : i32
    return %c0_i32, %c0_i32_0 : i32, i32
  }
  func.func @transform_7(%arg0: i32) -> (i32, i32) {
    %c0_i32 = arith.constant 0 : i32
    %c0_i32_0 = arith.constant 0 : i32
    %c0_i32_1 = arith.constant 0 : i32
    return %c0_i32, %c0_i32_0 : i32, i32
  }
  func.func @transform_8(%arg0: i32) -> (i32, i32) {
    %c0_i32 = arith.constant 0 : i32
    %c0_i32_0 = arith.constant 0 : i32
    %c0_i32_1 = arith.constant 0 : i32
    return %c0_i32, %c0_i32_0 : i32, i32
  }
  func.func @transform_9(%arg0: i32) -> (i32, i32) {
    %c0_i32 = arith.constant 0 : i32
    %c0_i32_0 = arith.constant 0 : i32
    %c0_i32_1 = arith.constant 0 : i32
    return %c0_i32, %c0_i32_0 : i32, i32
  }
  func.func @transform_10(%arg0: i32) -> (i32, i32) {
    %c0_i32 = arith.constant 0 : i32
    %c0_i32_0 = arith.constant 0 : i32
    %c0_i32_1 = arith.constant 0 : i32
    return %c0_i32, %c0_i32_0 : i32, i32
  }
  func.func @transform_11(%arg0: i32) -> (i32, i32) {
    %c0_i32 = arith.constant 0 : i32
    %c0_i32_0 = arith.constant 0 : i32
    %c0_i32_1 = arith.constant 0 : i32
    return %c0_i32, %c0_i32_0 : i32, i32
  }
  func.func @transform_12(%arg0: i32) -> (i32, i32) {
    %c0_i32 = arith.constant 0 : i32
    %c0_i32_0 = arith.constant 0 : i32
    %c0_i32_1 = arith.constant 0 : i32
    return %c0_i32, %c0_i32_0 : i32, i32
  }
  func.func @transform_13(%arg0: i32) -> (i32, i32) {
    %c0_i32 = arith.constant 0 : i32
    %c0_i32_0 = arith.constant 0 : i32
    %c0_i32_1 = arith.constant 0 : i32
    return %c0_i32, %c0_i32_0 : i32, i32
  }
  func.func @transform_14(%arg0: i32) -> (i32, i32) {
    %c0_i32 = arith.constant 0 : i32
    %c0_i32_0 = arith.constant 0 : i32
    %c0_i32_1 = arith.constant 0 : i32
    return %c0_i32, %c0_i32_0 : i32, i32
  }
  func.func @transform_15(%arg0: i32) -> (i32, i32) {
    %c0_i32 = arith.constant 0 : i32
    %c0_i32_0 = arith.constant 0 : i32
    %c0_i32_1 = arith.constant 0 : i32
    return %c0_i32, %c0_i32_0 : i32, i32
  }
  func.func @transform_16(%arg0: i32) -> (i32, i32) {
    %c0_i32 = arith.constant 0 : i32
    %c0_i32_0 = arith.constant 0 : i32
    %c0_i32_1 = arith.constant 0 : i32
    return %c0_i32, %c0_i32_0 : i32, i32
  }
  func.func @transform_17(%arg0: i32) -> (i32, i32) {
    %c0_i32 = arith.constant 0 : i32
    %c0_i32_0 = arith.constant 0 : i32
    %c0_i32_1 = arith.constant 0 : i32
    return %c0_i32, %c0_i32_0 : i32, i32
  }
  func.func @transform_18(%arg0: i32) -> (i32, i32) {
    %c0_i32 = arith.constant 0 : i32
    %c0_i32_0 = arith.constant 0 : i32
    %c0_i32_1 = arith.constant 0 : i32
    return %c0_i32, %c0_i32_0 : i32, i32
  }
  func.func @transform_19(%arg0: i32) -> (i32, i32) {
    %c0_i32 = arith.constant 0 : i32
    %c0_i32_0 = arith.constant 0 : i32
    %c0_i32_1 = arith.constant 0 : i32
    return %c0_i32, %c0_i32_0 : i32, i32
  }
  func.func @transform_20(%arg0: i32) -> (i32, i32) {
    %c0_i32 = arith.constant 0 : i32
    %c0_i32_0 = arith.constant 0 : i32
    %c0_i32_1 = arith.constant 0 : i32
    return %c0_i32, %c0_i32_0 : i32, i32
  }
  func.func @transform_21(%arg0: i32) -> (i32, i32) {
    %c0_i32 = arith.constant 0 : i32
    %c0_i32_0 = arith.constant 0 : i32
    %c0_i32_1 = arith.constant 0 : i32
    return %c0_i32, %c0_i32_0 : i32, i32
  }
}

</mosaic_0001>

<bundles_post_ra>
// kernel: tpu_custom_call.1
= control target key start
LH: loop header
LB: loop body
LE: loop exit
PB: predicated region body
PF: predicated region fallthrough
CT: control target
= control target key end

     0   :  { %s3122_s0 = inlined_call_operand.vmem [shape: f32[32,128], index: 0, kind: input, shape index: {}]   ;;  %s3123_s1 = inlined_call_operand.vmem [shape: f32[128,128], index: 1, kind: input, shape index: {}]   ;;  %s3124_s2 = inlined_call_operand.hbm [shape: f32[128,128], index: 2, kind: input, shape index: {}]   ;;  %s3125_s3 = inlined_call_operand.hbm [shape: f32[128,128], index: 3, kind: input, shape index: {}]   ;;  %s3126_s4 = inlined_call_operand.hbm [shape: f32[1,128], index: 4, kind: input, shape index: {}]   ;;  %s3127_s5 = inlined_call_operand.hbm [shape: f32[128,128], index: 5, kind: input, shape index: {}]   ;;  %s3128_s6 = inlined_call_operand.hbm [shape: f32[128,128], index: 6, kind: input, shape index: {}]   ;;  %s3129_s7 = inlined_call_operand.hbm [shape: f32[128,128], index: 7, kind: input, shape index: {}]   ;;  %s3130_s8 = inlined_call_operand.hbm [shape: f32[1,128], index: 8, kind: input, shape index: {}]   ;;  %s3131_s9 = inlined_call_operand.vmem [shape: f32[8,8], index: 9, kind: input, shape index: {}]   ;;  %s3132_s10 = inlined_call_operand.vmem [shape: f32[1,8], index: 10, kind: input, shape index: {}]   ;;  %s3133_s11 = inlined_call_operand.vmem [shape: f32[8,8], index: 11, kind: input, shape index: {}]   ;;  %s3134_s12 = inlined_call_operand.vmem [shape: f32[1,8], index: 12, kind: input, shape index: {}]   ;;  %s3135_s13 = inlined_call_operand.vmem [shape: f32[8,8], index: 13, kind: input, shape index: {}]   ;;  %s3136_s14 = inlined_call_operand.vmem [shape: f32[1,8], index: 14, kind: input, shape index: {}]   ;;  %s3137_s15 = inlined_call_operand.vmem [shape: f32[8,8], index: 15, kind: input, shape index: {}]   ;;  %s3138_s16 = inlined_call_operand.vmem [shape: f32[1,8], index: 16, kind: input, shape index: {}]   ;;  %s3139_s17 = inlined_call_operand.vmem [shape: f32[2,32], index: 17, kind: input, shape index: {}]   ;;  %s3140_s18 = inlined_call_operand.vmem [shape: f32[128,8], index: 18, kind: input, shape index: {}]   ;;  %s3141_s19 = inlined_call_operand.vmem [shape: f32[32,2], index: 19, kind: input, shape index: {}]   ;;  %s3142_s20 = inlined_call_operand.vmem [shape: f32[8,128], index: 20, kind: input, shape index: {}]   ;;  %s3143_s21 = inlined_call_operand.hbm [shape: f32[32,128], index: 21, kind: output, shape index: {}]  }
   0x1   :  { %3152 = sst [smem:[#allocation20_spill]] %s3122_s0 }
   0x2   :  { %3153 = sst [smem:[#allocation21_spill]] %s3123_s1 }
   0x3   :  { %3154 = sst [smem:[#allocation22_spill]] %s3124_s2 }
   0x4   :  { %3155 = sst [smem:[#allocation23_spill]] %s3125_s3 }
   0x5   :  { %3156 = sst [smem:[#allocation24_spill]] %s3126_s4 }
   0x6   :  { %3157 = sst [smem:[#allocation25_spill]] %s3127_s5 }
   0x7   :  { %3158 = sst [smem:[#allocation26_spill]] %s3141_s19 }
   0x8   :  { %3159 = sst [smem:[#allocation27_spill]] %s3143_s21 }
   0x9   :  { %26 = vsyncpa [#allocation3], 0 }
   0xa   :  { %27 = vsyncpa [#allocation6], 0 }
   0xb   :  { %28 = vsyncpa [#allocation9], 0 }
   0xc   :  { %29 = vsyncpa [#allocation12], 0 }
   0xd   :  { %30 = vsyncpa [#allocation4], 0  ;;  %s2570_s2 = smov [#allocation5]   ;;  %s2571_s26 = smov [#allocation8]  }
   0xe   :  { %s52_s25 = sshll.u32 %s2570_s2, 4  ;;  %s74_s27 = sshll.u32 %s2571_s26, 4  ;;  %s53_s25 = int_to_ptr.vmem [resolvable:$true] %s52_s25  ;;  %s2693_s27 = int_to_ptr.vmem [resolvable:$true] %s74_s27 }
   0xf   :  { %s3160_s29 = sld [smem:[#allocation23_spill]] }
  0x15   :  { %s2384_s0 = scalar_lea.hbm %s3160_s29, 2048 }
  0x16   :  { %p2385_p0 = scmp.ne.s32.totalorder %s3160_s29, %s2384_s0  ;;  %p2388_p1 = scmp.lt.u32.totalorder %s2384_s0, %s3160_s29 }
  0x18   :  { %p2390_p2 = pnand %p2388_p1, %p2385_p0 }
  0x1a   :  { %2393 = shalt.err (!%p2390_p2)
}
  0x1b   :  { %s2394_s23 = scalar_lea.vmem %s53_s25, 2048  ;;  %p2399_p4 = scmp.lt.s32.totalorder %s53_s25, %s53_s25 }
  0x1c   :  { %p2395_p3 = scmp.ne.s32.totalorder %s53_s25, %s2394_s23  ;;  %p2400_p5 = scmp.lt.s32.totalorder %s2394_s23, %s2394_s23 }
  0x1e   :  { %p2401_p6 = por %p2400_p5, %p2399_p4 }
  0x20   :  { %p2402_p7 = pnand %p2401_p6, %p2395_p3 }
  0x22   :  { %2405 = shalt.err (!%p2402_p7)
}
  0x23   :  { %s2572_s1 = smov 128   ;;  %s2573_s24 = smov 8  }
  0x24   :  { %58 = dma.hbm_to_vmem [thread:$0]  %s3160_s29, 2048, %s53_s25, [#allocation6], %s2572_s1, %s2572_s1, %s2573_s24  }
  0x25   :  { %s3161_s0 = sld [smem:[#allocation25_spill]] }
  0x2b   :  { %s2406_s4 = scalar_lea.hbm %s3161_s0, 2048 }
  0x2c   :  { %p2407_p8 = scmp.ne.s32.totalorder %s3161_s0, %s2406_s4  ;;  %p2410_p9 = scmp.lt.u32.totalorder %s2406_s4, %s3161_s0 }
  0x2e   :  { %p2412_p10 = pnand %p2410_p9, %p2407_p8 }
  0x30   :  { %2415 = shalt.err (!%p2412_p10)
}
  0x31   :  { %s2416_s21 = scalar_lea.vmem %s2693_s27, 2048  ;;  %p2421_p12 = scmp.lt.s32.totalorder %s2693_s27, %s2693_s27 }
  0x32   :  { %p2417_p11 = scmp.ne.s32.totalorder %s2693_s27, %s2416_s21  ;;  %p2422_p13 = scmp.lt.s32.totalorder %s2416_s21, %s2416_s21 }
  0x34   :  { %p2423_p0 = por %p2422_p13, %p2421_p12 }
  0x36   :  { %p2424_p1 = pnand %p2423_p0, %p2417_p11 }
  0x38   :  { %2427 = shalt.err (!%p2424_p1)
}
  0x39   :  { %80 = dma.hbm_to_vmem [thread:$0]  %s3161_s0, 2048, %s2693_s27, [#allocation9], %s2572_s1, %s2572_s1, %s2573_s24  }
  0x3a   :  { %s2574_s2 = smov [#allocation11]   ;;  %s2575_s3 = smov [#allocation2]  }
  0x3b   :  { %s98_s26 = sshll.u32 %s2574_s2, 4  ;;  %s40_s28 = sshll.u32 %s2575_s3, 4  ;;  %s99_s26 = int_to_ptr.vmem [resolvable:$true] %s98_s26  ;;  %s2730_s28 = int_to_ptr.vmem [resolvable:$true] %s40_s28 }
  0x3c   :  { %s2428_s30 = scalar_lea.hbm %s3129_s7, 2048 }
  0x3d   :  { %p2429_p2 = scmp.ne.s32.totalorder %s3129_s7, %s2428_s30  ;;  %p2432_p3 = scmp.lt.u32.totalorder %s2428_s30, %s3129_s7 }
  0x3f   :  { %p2434_p4 = pnand %p2432_p3, %p2429_p2 }
  0x41   :  { %2437 = shalt.err (!%p2434_p4)
}
  0x42   :  { %s2438_s27 = scalar_lea.vmem %s99_s26, 2048  ;;  %p2443_p6 = scmp.lt.s32.totalorder %s99_s26, %s99_s26 }
  0x43   :  { %p2439_p5 = scmp.ne.s32.totalorder %s99_s26, %s2438_s27  ;;  %p2444_p7 = scmp.lt.s32.totalorder %s2438_s27, %s2438_s27 }
  0x45   :  { %p2445_p8 = por %p2444_p7, %p2443_p6 }
  0x47   :  { %p2446_p9 = pnand %p2445_p8, %p2439_p5 }
  0x49   :  { %2449 = shalt.err (!%p2446_p9)
}
  0x4a   :  { %104 = dma.hbm_to_vmem [thread:$0]  %s3129_s7, 2048, %s99_s26, [#allocation12], %s2572_s1, %s2572_s1, %s2573_s24  }
  0x4b   :  { %s3162_s19 = sld [smem:[#allocation22_spill]] }
  0x51   :  { %s2450_s3 = scalar_lea.hbm %s3162_s19, 2048 }
  0x52   :  { %p2451_p10 = scmp.ne.s32.totalorder %s3162_s19, %s2450_s3  ;;  %p2454_p11 = scmp.lt.u32.totalorder %s2450_s3, %s3162_s19 }
  0x54   :  { %p2456_p12 = pnand %p2454_p11, %p2451_p10 }
  0x56   :  { %2459 = shalt.err (!%p2456_p12)
}
  0x57   :  { %s2460_s22 = scalar_lea.vmem %s2730_s28, 2048  ;;  %p2465_p0 = scmp.lt.s32.totalorder %s2730_s28, %s2730_s28 }
  0x58   :  { %p2461_p13 = scmp.ne.s32.totalorder %s2730_s28, %s2460_s22  ;;  %p2466_p1 = scmp.lt.s32.totalorder %s2460_s22, %s2460_s22 }
  0x5a   :  { %p2467_p2 = por %p2466_p1, %p2465_p0 }
  0x5c   :  { %p2468_p3 = pnand %p2467_p2, %p2461_p13 }
  0x5e   :  { %2471 = shalt.err (!%p2468_p3)
}
  0x5f   :  { %46 = dma.hbm_to_vmem [thread:$0]  %s3162_s19, 2048, %s2730_s28, [#allocation3], %s2572_s1, %s2572_s1, %s2573_s24  }
  0x60   :  { %s2576_s23 = smov [#allocation7]   ;;  %s2577_s0 = smov [#allocation10]  }
  0x61   :  { %s65_s27 = sshll.u32 %s2576_s23, 4  ;;  %s86_s25 = sshll.u32 %s2577_s0, 4  ;;  %s66_s27 = int_to_ptr.vmem [resolvable:$true] %s65_s27  ;;  %s2767_s25 = int_to_ptr.vmem [resolvable:$true] %s86_s25 }
  0x62   :  { %s3163_s3 = sld [smem:[#allocation24_spill]] }
  0x68   :  { %s2472_s4 = scalar_lea.hbm %s3163_s3, 16 }
  0x69   :  { %p2473_p4 = scmp.ne.s32.totalorder %s3163_s3, %s2472_s4  ;;  %p2476_p5 = scmp.lt.u32.totalorder %s2472_s4, %s3163_s3 }
  0x6b   :  { %p2478_p6 = pnand %p2476_p5, %p2473_p4 }
  0x6d   :  { %2481 = shalt.err (!%p2478_p6)
}
  0x6e   :  { %s2482_s28 = scalar_lea.vmem %s66_s27, 16  ;;  %s2486_s19 = scalar_lea.vmem %s66_s27, 32 }
  0x6f   :  { %p2483_p7 = scmp.ne.s32.totalorder %s66_s27, %s2482_s28  ;;  %p2487_p8 = scmp.lt.s32.totalorder %s66_s27, %s66_s27 }
  0x70   :  { %p2488_p9 = scmp.lt.s32.totalorder %s2486_s19, %s2482_s28 }
  0x72   :  { %p2489_p10 = por %p2488_p9, %p2487_p8 }
  0x74   :  { %p2490_p11 = pnand %p2489_p10, %p2483_p7 }
  0x76   :  { %2493 = shalt.err (!%p2490_p11)
}
  0x77   :  { %68 = dma.hbm_to_vmem [thread:$0]  %s3163_s3, 16, %s66_s27, [#allocation6]  }
  0x78   :  { %s2494_s29 = scalar_lea.hbm %s3128_s6, 2048 }
  0x79   :  { %p2495_p12 = scmp.ne.s32.totalorder %s3128_s6, %s2494_s29  ;;  %p2498_p13 = scmp.lt.u32.totalorder %s2494_s29, %s3128_s6 }
  0x7b   :  { %p2500_p0 = pnand %p2498_p13, %p2495_p12 }
  0x7d   :  { %2503 = shalt.err (!%p2500_p0)
}
  0x7e   :  { %s2504_s5 = scalar_lea.vmem %s2767_s25, 2048  ;;  %p2509_p2 = scmp.lt.s32.totalorder %s2767_s25, %s2767_s25 }
  0x7f   :  { %p2505_p1 = scmp.ne.s32.totalorder %s2767_s25, %s2504_s5  ;;  %p2510_p3 = scmp.lt.s32.totalorder %s2504_s5, %s2504_s5 }
  0x81   :  { %p2511_p4 = por %p2510_p3, %p2509_p2 }
  0x83   :  { %p2512_p5 = pnand %p2511_p4, %p2505_p1 }
  0x85   :  { %2515 = shalt.err (!%p2512_p5)
}
  0x86   :  { %92 = dma.hbm_to_vmem [thread:$0]  %s3128_s6, 2048, %s2767_s25, [#allocation9], %s2572_s1, %s2572_s1, %s2573_s24  }
  0x87   :  { %s2578_s22 = smov [#allocation13]   ;;  %s2516_s26 = scalar_lea.hbm %s3130_s8, 16 }
  0x88   :  { %s111_s28 = sshll.u32 %s2578_s22, 4  ;;  %p2517_p6 = scmp.ne.s32.totalorder %s3130_s8, %s2516_s26  ;;  %s112_s28 = int_to_ptr.vmem [resolvable:$true] %s111_s28 }
  0x89   :  { %p2520_p7 = scmp.lt.u32.totalorder %s2516_s26, %s3130_s8 }
  0x8b   :  { %p2522_p8 = pnand %p2520_p7, %p2517_p6 }
  0x8d   :  { %2525 = shalt.err (!%p2522_p8)
}
  0x8e   :  { %s2526_s4 = scalar_lea.vmem %s112_s28, 16  ;;  %s2530_s6 = scalar_lea.vmem %s112_s28, 32 }
  0x8f   :  { %p2527_p9 = scmp.ne.s32.totalorder %s112_s28, %s2526_s4  ;;  %p2531_p10 = scmp.lt.s32.totalorder %s112_s28, %s112_s28 }
  0x90   :  { %p2532_p11 = scmp.lt.s32.totalorder %s2530_s6, %s2526_s4 }
  0x92   :  { %p2533_p12 = por %p2532_p11, %p2531_p10 }
  0x94   :  { %p2534_p13 = pnand %p2533_p12, %p2527_p9 }
  0x96   :  { %2537 = shalt.err (!%p2534_p13)
}
  0x97   :  { %114 = dma.hbm_to_vmem [thread:$0]  %s3130_s8, 16, %s112_s28, [#allocation12]  }
  0x98   :  { %2560 = dma.done.wait [#allocation3], 2048  }
  0x99   :  { %2561 = vsyncadd [#allocation3], 4294965248 }
  0x9a   :  { %2562 = dma.done.wait [#allocation6], 2064  }
  0x9b   :  { %2563 = vsyncadd [#allocation6], 4294965232 }
  0x9c   :  { %2564 = dma.done.wait [#allocation9], 4096  }
  0x9d   :  { %2565 = vsyncadd [#allocation9], 4294963200 }
  0x9e   :  { %2566 = dma.done.wait [#allocation12], 2064  }
  0x9f   :  { %2567 = vsyncadd [#allocation12], 4294965232  ;;  %v283_v0 = vld [vmem:[#allocation2] sm:$0xff]  ;;  %v284_v1 = vld [vmem:[#allocation2 + $0x8] sm:$0xff]  ;;  %s3164_s5 = sld [smem:[#allocation20_spill]]  ;;  %v164_v23 = vlaneseq  ;;  %s3165_s22 = sld [smem:[#allocation21_spill]] }
  0xa0   :  { %v285_v2 = vld [vmem:[#allocation2 + $0x10] sm:$0xff]  ;;  %v2129_v3 = vpack.c.bf16 %v284_v1, %v283_v0  ;;  %v286_v4 = vld [vmem:[#allocation2 + $0x18] sm:$0xff]  ;;  %v287_v6 = vld [vmem:[#allocation2 + $0x20] sm:$0xff]  ;;  %v2579_v56 = vmov 0.0   ;;  %vm2581_vm6 = vmmov 0   ;;  %vm932_vm7 = vcmask 261120  }
  0xa1   :  { %v2133_v5 = vpack.c.bf16 %v286_v4, %v285_v2  ;;  %v288_v7 = vld [vmem:[#allocation2 + $0x28] sm:$0xff]  ;;  %v289_v10 = vld [vmem:[#allocation2 + $0x30] sm:$0xff]  ;;  %v290_v11 = vld [vmem:[#allocation2 + $0x38] sm:$0xff]  ;;  %v2819_v33 = vshrl.u32 %v164_v23, 7  ;;  %vm1100_vm8 = vcmask 64512   ;;  %vm1420_vm9 = vcmask 58368  }
  0xa2   :  { %2130 = vmatprep.subr.bf16.mxu0 %v2129_v3  ;;  %v2137_v8 = vpack.c.bf16 %v288_v7, %v287_v6  ;;  %v2141_v12 = vpack.c.bf16 %v290_v11, %v289_v10  ;;  %v291_v13 = vld [vmem:[#allocation2 + $0x40] sm:$0xff]  ;;  %v292_v14 = vld [vmem:[#allocation2 + $0x48] sm:$0xff]  ;;  %v293_v16 = vld [vmem:[#allocation2 + $0x50] sm:$0xff]  ;;  %s3166_s6 = sld [smem:[#allocation26_spill]]  ;;  %vm1510_vm10 = vcmask 15360   ;;  %vm1523_vm11 = vcmask 1041408  }
  0xa3   :  { %2132 = vmatpush3.bf16.msra.mxu0 %v2129_v3  ;;  %v2145_v15 = vpack.c.bf16 %v292_v14, %v291_v13  ;;  %v294_v17 = vld [vmem:[#allocation2 + $0x58] sm:$0xff]  ;;  %v295_v19 = vld [vmem:[#allocation2 + $0x60] sm:$0xff]  ;;  %v630_v21 = vld [vmem:[#allocation10 + $0x8] sm:$0xff]  ;;  %v173_v41 = vand.u32 15, %v2819_v33  ;;  %vm245_vm1 = vcmp.lt.s32.totalorder %v2819_v33, 1  ;;  %vm258_vm3 = vcmp.lt.s32.totalorder %v2819_v33, 7 }
  0xa4   :  { %2134 = vmatprep.subr.bf16.mxu0 %v2133_v5  ;;  %v2149_v18 = vpack.c.bf16 %v294_v17, %v293_v16  ;;  %v629_v20 = vld [vmem:[#allocation10] sm:$0xff]  ;;  %v631_v25 = vld [vmem:[#allocation10 + $0x10] sm:$0xff]  ;;  %v632_v26 = vld [vmem:[#allocation10 + $0x18] sm:$0xff] }
  0xa5   :  { %v2816_v9 = vld [vmem:[%s3164_s5] sm:$0xff]  ;;  %v296_v22 = vld [vmem:[#allocation2 + $0x68] sm:$0xff]  ;;  %v2225_v24 = vpack.c.bf16 %v630_v21, %v629_v20  ;;  %v2229_v27 = vpack.c.bf16 %v632_v26, %v631_v25  ;;  %v297_v31 = vld [vmem:[#allocation2 + $0x70] sm:$0xff]  ;;  %vm217_vm0 = vcmp.ne.s32.totalorder %v173_v41, 0 }
  0xa6   :  { %1854 = vmatprep.mubr.f32.mxu0 %v2816_v9  ;;  %v633_v28 = vld [vmem:[#allocation10 + $0x20] sm:$0xff]  ;;  %v634_v29 = vld [vmem:[#allocation10 + $0x28] sm:$0xff]  ;;  %v2153_v30 = vpack.c.bf16 %v296_v22, %v295_v19  ;;  %v298_v32 = vld [vmem:[#allocation2 + $0x78] sm:$0xff]  ;;  %v241_v45 = vrot.slane %v2816_v9, 7  ;;  %v2853_v57 = vsel %vm217_vm0, 1.0, %v2579_v56 }
  0xa7   :  { %2136 = vmatpush3.bf16.msra.mxu0 %v2133_v5  ;;  %2226 = vmatprep.subr.bf16.mxu1 %v2225_v24  ;;  %v2233_v34 = vpack.c.bf16 %v634_v29, %v633_v28  ;;  %v635_v35 = vld [vmem:[#allocation10 + $0x30] sm:$0xff]  ;;  %v636_v36 = vld [vmem:[#allocation10 + $0x38] sm:$0xff]  ;;  %v2157_v37 = vpack.c.bf16 %v298_v32, %v297_v31  ;;  %v268_v39 = vld [vmem:[%s3165_s22 + $0x8] sm:$0xff] }
  0xa8   :  { %2138 = vmatprep.subr.bf16.mxu0 %v2137_v8  ;;  %2228 = vmatpush3.bf16.msra.mxu1 %v2225_v24  ;;  %v267_v38 = vld [vmem:[%s3165_s22] sm:$0xff]  ;;  %v2830_v40 = vld [vmem:[%s3164_s5 + $0x18] sm:$0xff]  ;;  %v2237_v42 = vpack.c.bf16 %v636_v36, %v635_v35  ;;  %v638_v44 = vld [vmem:[#allocation10 + $0x48] sm:$0xff] }
  0xa9   :  { %2230 = vmatprep.subr.bf16.mxu1 %v2229_v27  ;;  %v637_v43 = vld [vmem:[#allocation10 + $0x40] sm:$0xff]  ;;  %v2161_v46 = vpack.c.bf16 %v268_v39, %v267_v38  ;;  %v244_v47 = vrot.slane %v2830_v40, 7  ;;  %v269_v48 = vld [vmem:[%s3165_s22 + $0x10] sm:$0xff]  ;;  %v270_v49 = vld [vmem:[%s3165_s22 + $0x18] sm:$0xff] }
  0xaa   :  { %v2241_v50 = vpack.c.bf16 %v638_v44, %v637_v43  ;;  %v639_v51 = vld [vmem:[#allocation10 + $0x50] sm:$0xff]  ;;  %v640_v52 = vld [vmem:[#allocation10 + $0x58] sm:$0xff]  ;;  %v2845_v53 = vld [vmem:[%s3164_s5 + $0x8] sm:$0xff]  ;;  %v2165_v54 = vpack.c.bf16 %v270_v49, %v269_v48 }
  0xab   :  { %2140 = vmatpush3.bf16.msra.mxu0 %v2137_v8  ;;  %v2850_v55 = vld [vmem:[%s3164_s5 + $0x10] sm:$0xff]  ;;  %v249_v58 = vsel %vm245_vm1, %v244_v47, %v241_v45  ;;  %v271_v59 = vld [vmem:[%s3165_s22 + $0x20] sm:$0xff]  ;;  %v272_v60 = vld [vmem:[%s3165_s22 + $0x28] sm:$0xff]  ;;  %v2245_v61 = vpack.c.bf16 %v640_v52, %v639_v51  ;;  %v242_v24 = vrot.slane %v2845_v53, 7  ;;  %v255_v35 = vrot.slane %v2845_v53, 1 }
  0xac   :  { %2142 = vmatprep.subr.bf16.mxu0 %v2141_v12  ;;  %2232 = vmatpush3.bf16.msra.mxu1 %v2229_v27  ;;  %v641_v62 = vld [vmem:[#allocation10 + $0x60] sm:$0xff]  ;;  %v642_v63 = vld [vmem:[#allocation10 + $0x68] sm:$0xff]  ;;  %v250_v0 = vmul.f32 %v2853_v57, %v249_v58  ;;  %v2169_v1 = vpack.c.bf16 %v272_v60, %v271_v59  ;;  %v274_v3 = vld [vmem:[%s3165_s22 + $0x38] sm:$0xff]  ;;  %v243_v20 = vrot.slane %v2850_v55, 7  ;;  %v166_v51 = vadd.s32 8, %v2819_v33 }
  0xad   :  { %2234 = vmatprep.subr.bf16.mxu1 %v2233_v34  ;;  %v273_v2 = vld [vmem:[%s3165_s22 + $0x30] sm:$0xff]  ;;  %v2249_v4 = vpack.c.bf16 %v642_v63, %v641_v62  ;;  %v275_v6 = vld [vmem:[%s3165_s22 + $0x40] sm:$0xff]  ;;  %v276_v7 = vld [vmem:[%s3165_s22 + $0x48] sm:$0xff]  ;;  %v168_v60 = vadd.s32 24, %v2819_v33  ;;  %v256_v63 = vrot.slane %v2850_v55, 1 }
  0xae   :  { %v2173_v5 = vpack.c.bf16 %v274_v3, %v273_v2  ;;  %v2177_v8 = vpack.c.bf16 %v276_v7, %v275_v6  ;;  %v277_v10 = vld [vmem:[%s3165_s22 + $0x50] sm:$0xff]  ;;  %v278_v11 = vld [vmem:[%s3165_s22 + $0x58] sm:$0xff]  ;;  %v279_v13 = vld [vmem:[%s3165_s22 + $0x60] sm:$0xff]  ;;  %v247_v27 = vsel %vm245_vm1, %v242_v24, %v243_v20  ;;  %v246_v38 = vsel %vm245_vm1, %v243_v20, %v244_v47 }
  0xaf   :  { %2144 = vmatpush3.bf16.msra.mxu0 %v2141_v12  ;;  %v2181_v12 = vpack.c.bf16 %v278_v11, %v277_v10  ;;  %v280_v14 = vld [vmem:[%s3165_s22 + $0x68] sm:$0xff]  ;;  %v281_v17 = vld [vmem:[%s3165_s22 + $0x70] sm:$0xff]  ;;  %v469_v22 = vld [vmem:[#allocation5] sm:$0xff]  ;;  %v180_v59 = vand.u32 15, %v166_v51  ;;  %v260_v3 = vsel %vm258_vm3, %v255_v35, %v256_v63 }
  0xb0   :  { %2146 = vmatprep.subr.bf16.mxu0 %v2145_v15  ;;  %2236 = vmatpush3.bf16.msra.mxu1 %v2233_v34  ;;  %v2185_v16 = vpack.c.bf16 %v280_v14, %v279_v13  ;;  %v470_v23 = vld [vmem:[#allocation5 + $0x8] sm:$0xff]  ;;  %v471_v28 = vld [vmem:[#allocation5 + $0x10] sm:$0xff]  ;;  %v472_v29 = vld [vmem:[#allocation5 + $0x18] sm:$0xff]  ;;  %v254_v34 = vrot.slane %v2816_v9, 1 }
  0xb1   :  { %2238 = vmatprep.subr.bf16.mxu1 %v2237_v42  ;;  %v2193_v25 = vpack.c.bf16 %v470_v23, %v469_v22  ;;  %v2197_v32 = vpack.c.bf16 %v472_v29, %v471_v28  ;;  %v473_v36 = vld [vmem:[#allocation5 + $0x20] sm:$0xff]  ;;  %v476_v43 = vld [vmem:[#allocation5 + $0x38] sm:$0xff]  ;;  %v479_v49 = vld [vmem:[#allocation5 + $0x50] sm:$0xff]  ;;  %vm230_vm4 = vcmp.ne.s32.totalorder %v180_v59, 15 }
  0xb2   :  { %v261_v41 = vsel %vm258_vm3, %v254_v34, %v255_v35  ;;  %v481_v52 = vld [vmem:[#allocation5 + $0x60] sm:$0xff]  ;;  %v484_v62 = vld [vmem:[#allocation5 + $0x78] sm:$0xff]  ;;  %v2927_v2 = vsel %vm230_vm4, 1.0, %v2579_v56 }
  0xb3   :  { %2148 = vmatpush3.bf16.msra.mxu0 %v2145_v15  ;;  %v167_v15 = vadd.s32 16, %v2819_v33  ;;  %v643_v11 = vld [vmem:[#allocation10 + $0x70] sm:$0xff]  ;;  %v613_v14 = vld [vmem:[#allocation8] sm:$0xff]  ;;  %v616_v23 = vld [vmem:[#allocation8 + $0x18] sm:$0xff] }
  0xb4   :  { %2150 = vmatprep.subr.bf16.mxu0 %v2149_v18  ;;  %2240 = vmatpush3.bf16.msra.mxu1 %v2237_v42  ;;  %v475_v42 = vld [vmem:[#allocation5 + $0x30] sm:$0xff]  ;;  %v628_v33 = vld [vmem:[#allocation8 + $0x78] sm:$0xff] }
  0xb5   :  { %2242 = vmatprep.subr.bf16.mxu1 %v2241_v50  ;;  %v187_v19 = vand.u32 15, %v167_v15  ;;  %v2205_v44 = vpack.c.bf16 %v476_v43, %v475_v42  ;;  %v614_v15 = vld [vmem:[#allocation8 + $0x8] sm:$0xff]  ;;  %v615_v22 = vld [vmem:[#allocation8 + $0x10] sm:$0xff] }
  0xb7   :  { %2152 = vmatpush3.bf16.msra.mxu0 %v2149_v18  ;;  %v282_v18 = vld [vmem:[%s3165_s22 + $0x78] sm:$0xff]  ;;  %vm219_vm2 = vcmp.ne.s32.totalorder %v187_v19, 0 }
  0xb8   :  { %2154 = vmatprep.subr.bf16.mxu0 %v2153_v30  ;;  %2244 = vmatpush3.bf16.msra.mxu1 %v2241_v50  ;;  %v2189_v21 = vpack.c.bf16 %v282_v18, %v281_v17  ;;  %v2905_v26 = vsel %vm219_vm2, 1.0, %v2579_v56  ;;  %v480_v50 = vld [vmem:[#allocation5 + $0x58] sm:$0xff]  ;;  %v1648_v17 = vld [vmem:[#allocation7] ss:$0 sm:$0xff] }
  0xb9   :  { %2246 = vmatprep.subr.bf16.mxu1 %v2245_v61  ;;  %v252_v31 = vmul.f32 %v2905_v26, %v247_v27  ;;  %v2213_v47 = vpack.c.bf16 %v480_v50, %v479_v49  ;;  %v619_v50 = vld [vmem:[#allocation8 + $0x30] sm:$0xff] }
  0xbb   :  { %2156 = vmatpush3.bf16.msra.mxu0 %v2153_v30  ;;  %v248_v30 = vsel %vm245_vm1, %v241_v45, %v242_v24  ;;  %v477_v45 = vld [vmem:[#allocation5 + $0x40] sm:$0xff] }
  0xbc   :  { %2158 = vmatprep.subr.bf16.mxu0 %v2157_v37  ;;  %2248 = vmatpush3.bf16.msra.mxu1 %v2245_v61  ;;  %v483_v61 = vld [vmem:[#allocation5 + $0x70] sm:$0xff] }
  0xbd   :  { %2250 = vmatprep.subr.bf16.mxu1 %v2249_v4 }
  0xbf   :  { %2160 = vmatpush3.bf16.msra.mxu0 %v2157_v37  ;;  %v474_v37 = vld [vmem:[#allocation5 + $0x28] sm:$0xff] }
  0xc0   :  { %2162 = vmatprep.subr.bf16.mxu0 %v2161_v46  ;;  %2252 = vmatpush3.bf16.msra.mxu1 %v2249_v4  ;;  %v2201_v39 = vpack.c.bf16 %v474_v37, %v473_v36  ;;  %v257_v4 = vrot.slane %v2830_v40, 1  ;;  %v617_v37 = vld [vmem:[#allocation8 + $0x20] sm:$0xff] }
  0xc2   :  { %1855 = vmatmul.mubr.f32.vlgmr.msra.gmra.mrb[0].mxu0 %v2845_v53  ;;  %v262_v7 = vsel %vm258_vm3, %v257_v4, %v254_v34 }
  0xc3   :  { %2164 = vmatpush3.bf16.msra.mxu0 %v2161_v46  ;;  %1857 = vmatprep.mubr.f32.mxu0 %v2850_v55  ;;  %v478_v46 = vld [vmem:[#allocation5 + $0x48] sm:$0xff] }
  0xc4   :  { %2166 = vmatprep.subr.bf16.mxu0 %v2165_v54  ;;  %v2209_v48 = vpack.c.bf16 %v478_v46, %v477_v45 }
  0xc6   :  { %1858 = vmatmul.mubr.f32.gmra.mrb[2].mxu0 %v2830_v40 }
  0xc7   :  { %2168 = vmatpush3.bf16.msra.mxu0 %v2165_v54  ;;  %1892 = vmatprep.mubr.f32.mxu0 %v250_v0  ;;  %v482_v54 = vld [vmem:[#allocation5 + $0x68] sm:$0xff]  ;;  %v2221_v0 = vpack.c.bf16 %v484_v62, %v483_v61 }
  0xc8   :  { %2170 = vmatprep.subr.bf16.mxu0 %v2169_v1  ;;  %v2217_v58 = vpack.c.bf16 %v482_v54, %v481_v52 }
  0xcb   :  { %2172 = vmatpush3.bf16.msra.mxu0 %v2169_v1  ;;  %v194_v1 = vand.u32 15, %v168_v60 }
  0xcc   :  { %2174 = vmatprep.subr.bf16.mxu0 %v2173_v5 }
  0xcd   :  { %vm232_vm5 = vcmp.ne.s32.totalorder %v194_v1, 15 }
  0xce   :  { %v2934_v6 = vsel %vm232_vm5, 1.0, %v2579_v56 }
  0xcf   :  { %2176 = vmatpush3.bf16.msra.mxu0 %v2173_v5  ;;  %v264_v5 = vmul.f32 %v2927_v2, %v260_v3  ;;  %v266_v10 = vmul.f32 %v2934_v6, %v262_v7  ;;  %v623_v3 = vld [vmem:[#allocation8 + $0x50] sm:$0xff]  ;;  %v626_v7 = vld [vmem:[#allocation8 + $0x68] sm:$0xff] }
  0xd0   :  { %2178 = vmatprep.subr.bf16.mxu0 %v2177_v8 }
  0xd3   :  { %2180 = vmatpush3.bf16.msra.mxu0 %v2177_v8  ;;  %v259_v8 = vsel %vm258_vm3, %v256_v63, %v257_v4  ;;  %v621_v63 = vld [vmem:[#allocation8 + $0x40] sm:$0xff] }
  0xd4   :  { %2182 = vmatprep.subr.bf16.mxu0 %v2181_v12 }
  0xd7   :  { %2184 = vmatpush3.bf16.msra.mxu0 %v2181_v12  ;;  %v644_v12 = vld [vmem:[#allocation10 + $0x78] sm:$0xff] }
  0xd8   :  { %2186 = vmatprep.subr.bf16.mxu0 %v2185_v16  ;;  %v2253_v13 = vpack.c.bf16 %v644_v12, %v643_v11  ;;  %v815_v12 = vld [vmem:[#allocation11] sm:$0xff] }
  0xda   :  { %2254 = vmatprep.subr.bf16.mxu1 %v2253_v13 }
  0xdb   :  { %2188 = vmatpush3.bf16.msra.mxu0 %v2185_v16  ;;  %2256 = vmatpush3.bf16.msra.mxu1 %v2253_v13  ;;  %v2257_v16 = vpack.c.bf16 %v614_v15, %v613_v14  ;;  %v816_v13 = vld [vmem:[#allocation11 + $0x8] sm:$0xff]  ;;  %v817_v15 = vld [vmem:[#allocation11 + $0x10] sm:$0xff] }
  0xdc   :  { %2190 = vmatprep.subr.bf16.mxu0 %v2189_v21  ;;  %v2289_v14 = vpack.c.bf16 %v816_v13, %v815_v12 }
  0xdd   :  { %2258 = vmatprep.subr.bf16.mxu1 %v2257_v16 }
  0xdf   :  { %2192 = vmatpush3.bf16.msra.mxu0 %v2189_v21 }
  0xe0   :  { %2194 = vmatprep.subr.bf16.mxu0 %v2193_v25 }
  0xe2   :  { %1893 = vmatmul.mubr.f32.vlgmr.msra.gmra.mrb[0].mxu0 %v248_v30 }
  0xe3   :  { %2196 = vmatpush3.bf16.msra.mxu0 %v2193_v25  ;;  %1895 = vmatprep.mubr.f32.mxu0 %v252_v31 }
  0xe4   :  { %2198 = vmatprep.subr.bf16.mxu0 %v2197_v32 }
  0xe6   :  { %1896 = vmatmul.mubr.f32.gmra.mrb[2].mxu0 %v246_v38  ;;  %v618_v38 = vld [vmem:[#allocation8 + $0x28] sm:$0xff] }
  0xe7   :  { %2200 = vmatpush3.bf16.msra.mxu0 %v2197_v32  ;;  %1930 = vmatprep.mubr.f32.mxu0 %v261_v41  ;;  %v2261_v32 = vpack.c.bf16 %v616_v23, %v615_v22  ;;  %v2265_v46 = vpack.c.bf16 %v618_v38, %v617_v37  ;;  %v821_v22 = vld [vmem:[#allocation11 + $0x30] sm:$0xff]  ;;  %v822_v23 = vld [vmem:[#allocation11 + $0x38] sm:$0xff] }
  0xe8   :  { %2202 = vmatprep.subr.bf16.mxu0 %v2201_v39 }
  0xeb   :  { %2204 = vmatpush3.bf16.msra.mxu0 %v2201_v39 }
  0xec   :  { %2206 = vmatprep.subr.bf16.mxu0 %v2205_v44 }
  0xef   :  { %2208 = vmatpush3.bf16.msra.mxu0 %v2205_v44 }
  0xf0   :  { %2210 = vmatprep.subr.bf16.mxu0 %v2209_v48 }
  0xf3   :  { %2212 = vmatpush3.bf16.msra.mxu0 %v2209_v48 }
  0xf4   :  { %2214 = vmatprep.subr.bf16.mxu0 %v2213_v47 }
  0xf7   :  { %2216 = vmatpush3.bf16.msra.mxu0 %v2213_v47  ;;  %v620_v47 = vld [vmem:[#allocation8 + $0x38] sm:$0xff] }
  0xf8   :  { %2218 = vmatprep.subr.bf16.mxu0 %v2217_v58  ;;  %v2269_v61 = vpack.c.bf16 %v620_v47, %v619_v50  ;;  %v1012_v50 = vld [vmem:[%s3140_s18 + $0x30] sm:$0xff]  ;;  %v1013_v47 = vld [vmem:[%s3140_s18 + $0x38] sm:$0xff] }
  0xfb   :  { %2220 = vmatpush3.bf16.msra.mxu0 %v2217_v58 }
  0xfc   :  { %2222 = vmatprep.subr.bf16.mxu0 %v2221_v0 }
  0xff   :  { %2224 = vmatpush3.bf16.msra.mxu0 %v2221_v0  ;;  %v622_v0 = vld [vmem:[#allocation8 + $0x48] sm:$0xff] }
 0x100   :  { %v2273_v1 = vpack.c.bf16 %v622_v0, %v621_v63  ;;  %v1019_v63 = vld [vmem:[%s3140_s18 + $0x68] sm:$0xff] }
 0x102   :  { %1931 = vmatmul.mubr.f32.vlgmr.msra.gmra.mrb[0].mxu0 %v264_v5  ;;  %v625_v5 = vld [vmem:[#allocation8 + $0x60] sm:$0xff] }
 0x103   :  { %1933 = vmatprep.mubr.f32.mxu0 %v259_v8  ;;  %v2281_v8 = vpack.c.bf16 %v626_v7, %v625_v5 }
 0x106   :  { %1934 = vmatmul.mubr.f32.gmra.mrb[2].mxu0 %v266_v10  ;;  %v627_v10 = vld [vmem:[#allocation8 + $0x70] sm:$0xff] }
 0x107   :  { %v2285_v11 = vpack.c.bf16 %v628_v33, %v627_v10  ;;  %2058 = vmatprep.mubr.msk.f32.mxu0 %vm2581_vm6, %v2579_v56 }
 0x1d5   :  { %v1932_v18 = vpop.f32.mrb[0].mxu0 }
 0x1d6   :  { %v582_v19 = vadd.f32 %v1932_v18, %v1648_v17  ;;  %v551_v20 = vpop.f32.mrb[1].mxu0 }
 0x1d7   :  { %v581_v21 = vadd.f32 %v1648_v17, %v551_v20  ;;  %v820_v20 = vld [vmem:[#allocation11 + $0x28] sm:$0xff] }
 0x1d8   :  { %v586_v24 = vmax.f32 %v582_v19, 0.0  ;;  %v819_v19 = vld [vmem:[#allocation11 + $0x20] sm:$0xff] }
 0x1d9   :  { %v585_v25 = vmax.f32 %v581_v21, 0.0  ;;  %v1935_v27 = vpop.f32.mrb[2].mxu0  ;;  %v2297_v21 = vpack.c.bf16 %v820_v20, %v819_v19  ;;  %v1092_v19 = vld [vmem:[%s3131_s9] sm:$0xff] }
 0x1da   :  { %v590_v28 = vrot.slane %v586_v24, 7  ;;  %v602_v29 = vrot.slane %v586_v24, 1  ;;  %v584_v30 = vadd.f32 %v1935_v27, %v1648_v17  ;;  %v561_v31 = vpop.f32.mrb[3].mxu0  ;;  %v824_v27 = vld [vmem:[#allocation11 + $0x48] sm:$0xff] }
 0x1db   :  { %v589_v34 = vrot.slane %v585_v25, 7  ;;  %v601_v35 = vrot.slane %v585_v25, 1  ;;  %v583_v36 = vadd.f32 %v1648_v17, %v561_v31  ;;  %1968 = vmatprep.mubr.f32.mxu1 %v585_v25  ;;  %v823_v25 = vld [vmem:[#allocation11 + $0x40] sm:$0xff] }
 0x1dc   :  { %v588_v39 = vmax.f32 %v584_v30, 0.0  ;;  %1969 = vmatmul.mubr.f32.vlgmr.msra.gmra.mrb[0].mxu1 %v586_v24  ;;  %v2301_v24 = vpack.c.bf16 %v822_v23, %v821_v22  ;;  %v827_v31 = vld [vmem:[#allocation11 + $0x60] sm:$0xff]  ;;  %v1651_v23 = vld [vmem:[%s3132_s10] ss:$0 sm:$0xff] }
 0x1dd   :  { %v587_v41 = vmax.f32 %v583_v36, 0.0  ;;  %2260 = vmatpush3.bf16.msra.mxu1 %v2257_v16  ;;  %v595_v42 = vsel %vm245_vm1, %v589_v34, %v590_v28  ;;  %v2945_v43 = vsel %vm258_vm3, %v601_v35, %v602_v29  ;;  %v818_v16 = vld [vmem:[#allocation11 + $0x18] sm:$0xff] }
 0x1de   :  { %v592_v44 = vrot.slane %v588_v39, 7  ;;  %v604_v45 = vrot.slane %v588_v39, 1  ;;  %2262 = vmatprep.subr.bf16.mxu1 %v2261_v32  ;;  %v2293_v17 = vpack.c.bf16 %v818_v16, %v817_v15  ;;  %v830_v36 = vld [vmem:[#allocation11 + $0x78] sm:$0xff] }
 0x1df   :  { %v591_v48 = vrot.slane %v587_v41, 7  ;;  %v603_v49 = vrot.slane %v587_v41, 1  ;;  %1971 = vmatprep.mubr.f32.mxu1 %v587_v41  ;;  %v2580_v41 = vmov 0.0|0.0   ;;  %v931_v16 = vld [vmem:[%s3139_s17] sm:$0x3] }
 0x1e0   :  { %1972 = vmatmul.mubr.f32.gmra.mrb[2].mxu1 %v588_v39  ;;  %v596_v51 = vsel %vm245_vm1, %v592_v44, %v589_v34  ;;  %v2951_v52 = vsel %vm258_vm3, %v604_v45, %v601_v35  ;;  %v829_v35 = vld [vmem:[#allocation11 + $0x70] sm:$0xff]  ;;  %2321 = vmatprep.subr.bf16.mxu0 %v2580_v41  ;;  %v1175_v22 = vld [vmem:[%s3133_s11] sm:$0xff] }
 0x1e1   :  { %v2955_v54 = vsel %vm258_vm3, %v602_v29, %v603_v49  ;;  %2264 = vmatpush3.bf16.msra.mxu1 %v2261_v32  ;;  %v597_v58 = vmul.f32 %v2853_v57, %v596_v51  ;;  %v594_v59 = vsel %vm245_vm1, %v590_v28, %v591_v48  ;;  %v593_v60 = vsel %vm245_vm1, %v591_v48, %v592_v44  ;;  %v624_v57 = vld [vmem:[#allocation8 + $0x58] sm:$0xff]  ;;  %v825_v28 = vld [vmem:[#allocation11 + $0x50] sm:$0xff]  ;;  %v828_v32 = vld [vmem:[#allocation11 + $0x68] sm:$0xff] }
 0x1e2   :  { %2266 = vmatprep.subr.bf16.mxu1 %v2265_v46  ;;  %v2964_v62 = vsel %vm258_vm3, %v603_v49, %v604_v45  ;;  %v2277_v4 = vpack.c.bf16 %v624_v57, %v623_v3  ;;  %v599_v18 = vmul.f32 %v2905_v26, %v594_v59  ;;  %v2305_v26 = vpack.c.bf16 %v824_v27, %v823_v25  ;;  %v826_v29 = vld [vmem:[#allocation11 + $0x58] sm:$0xff]  ;;  %v1011_v48 = vld [vmem:[%s3140_s18 + $0x28] sm:$0xff]  ;;  %v1016_v59 = vld [vmem:[%s3140_s18 + $0x50] sm:$0xff] }
 0x1e3   :  { %2006 = vmatprep.mubr.f32.mxu1 %v597_v58  ;;  %v2309_v30 = vpack.c.bf16 %v826_v29, %v825_v28  ;;  %v2313_v34 = vpack.c.bf16 %v828_v32, %v827_v31  ;;  %v2317_v37 = vpack.c.bf16 %v830_v36, %v829_v35  ;;  %v610_v38 = vmul.f32 %v2927_v2, %v2955_v54  ;;  %v1006_v2 = vld [vmem:[%s3140_s18] sm:$0xff]  ;;  %v1009_v44 = vld [vmem:[%s3140_s18 + $0x18] sm:$0xff]  ;;  %v1015_v54 = vld [vmem:[%s3140_s18 + $0x48] sm:$0xff] }
 0x1e4   :  { %v612_v39 = vmul.f32 %v2934_v6, %v2951_v52  ;;  %v1008_v6 = vld [vmem:[%s3140_s18 + $0x10] sm:$0xff]  ;;  %v2337_v51 = vpack.c.bf16 %v1013_v47, %v1012_v50  ;;  %v1014_v52 = vld [vmem:[%s3140_s18 + $0x40] sm:$0xff]  ;;  %v1021_v3 = vld [vmem:[%s3140_s18 + $0x78] sm:$0xff] }
 0x1e5   :  { %2268 = vmatpush3.bf16.msra.mxu1 %v2265_v46  ;;  %v2331_v45 = vpack.c.bf16 %v1009_v44, %v1008_v6  ;;  %v1010_v46 = vld [vmem:[%s3140_s18 + $0x20] sm:$0xff]  ;;  %v2340_v58 = vpack.c.bf16 %v1015_v54, %v1014_v52 }
 0x1e6   :  { %2270 = vmatprep.subr.bf16.mxu1 %v2269_v61  ;;  %v2334_v49 = vpack.c.bf16 %v1011_v48, %v1010_v46  ;;  %v1257_v28 = vld [vmem:[%s3135_s13] sm:$0xff] }
 0x1e7   :  { %v1653_v29 = vld [vmem:[%s3134_s12] ss:$0 sm:$0xff] }
 0x1e8   :  { %v1339_v35 = vld [vmem:[%s3137_s15] sm:$0xff] }
 0x1e9   :  { %2272 = vmatpush3.bf16.msra.mxu1 %v2269_v61  ;;  %v1655_v36 = vld [vmem:[%s3136_s14] ss:$0 sm:$0xff] }
 0x1ea   :  { %2274 = vmatprep.subr.bf16.mxu1 %v2273_v1  ;;  %v1506_v54 = vld [vmem:[%s3166_s6] sm:$0xff] }
 0x1ed   :  { %2276 = vmatpush3.bf16.msra.mxu1 %v2273_v1  ;;  %v1020_v1 = vld [vmem:[%s3140_s18 + $0x70] sm:$0xff] }
 0x1ee   :  { %2278 = vmatprep.subr.bf16.mxu1 %v2277_v4  ;;  %v2349_v57 = vpack.c.bf16 %v1021_v3, %v1020_v1 }
 0x1f1   :  { %2280 = vmatpush3.bf16.msra.mxu1 %v2277_v4  ;;  %v1649_v4 = vld [vmem:[#allocation13] ss:$0 sm:$0xff] }
 0x1f2   :  { %2282 = vmatprep.subr.bf16.mxu1 %v2281_v8 }
 0x1f5   :  { %2284 = vmatpush3.bf16.msra.mxu1 %v2281_v8 }
 0x1f6   :  { %2286 = vmatprep.subr.bf16.mxu1 %v2285_v11 }
 0x1f9   :  { %2288 = vmatpush3.bf16.msra.mxu1 %v2285_v11 }
 0x1fa   :  { %2290 = vmatprep.subr.bf16.mxu1 %v2289_v14 }
 0x1fc   :  { %2007 = vmatmul.mubr.f32.vlgmr.msra.gmra.mrb[0].mxu1 %v595_v42  ;;  %v1007_v42 = vld [vmem:[%s3140_s18 + $0x8] sm:$0xff] }
 0x1fd   :  { %2009 = vmatprep.mubr.f32.mxu1 %v599_v18  ;;  %2292 = vmatpush3.bf16.msra.mxu1 %v2289_v14 }
 0x1fe   :  { %2294 = vmatprep.subr.bf16.mxu1 %v2293_v17 }
 0x200   :  { %2010 = vmatmul.mubr.f32.gmra.mrb[2].mxu1 %v593_v60  ;;  %v1017_v60 = vld [vmem:[%s3140_s18 + $0x58] sm:$0xff] }
 0x201   :  { %2296 = vmatpush3.bf16.msra.mxu1 %v2293_v17  ;;  %2044 = vmatprep.mubr.f32.mxu1 %v2945_v43  ;;  %v2328_v43 = vpack.c.bf16 %v1007_v42, %v1006_v2  ;;  %v2343_v61 = vpack.c.bf16 %v1017_v60, %v1016_v59  ;;  %v1657_v2 = vld [vmem:[%s3138_s16] ss:$0 sm:$0xff]  ;;  %v1507_v59 = vld [vmem:[%s3166_s6 + $0x8] sm:$0xff] }
 0x202   :  { %2298 = vmatprep.subr.bf16.mxu1 %v2297_v21 }
 0x205   :  { %2300 = vmatpush3.bf16.msra.mxu1 %v2297_v21 }
 0x206   :  { %2302 = vmatprep.subr.bf16.mxu1 %v2301_v24 }
 0x209   :  { %2304 = vmatpush3.bf16.msra.mxu1 %v2301_v24 }
 0x20a   :  { %2306 = vmatprep.subr.bf16.mxu1 %v2305_v26 }
 0x20d   :  { %2308 = vmatpush3.bf16.msra.mxu1 %v2305_v26 }
 0x20e   :  { %2310 = vmatprep.subr.bf16.mxu1 %v2309_v30 }
 0x211   :  { %2312 = vmatpush3.bf16.msra.mxu1 %v2309_v30 }
 0x212   :  { %2314 = vmatprep.subr.bf16.mxu1 %v2313_v34 }
 0x215   :  { %2316 = vmatpush3.bf16.msra.mxu1 %v2313_v34 }
 0x216   :  { %2318 = vmatprep.subr.bf16.mxu1 %v2317_v37 }
 0x219   :  { %2320 = vmatpush3.bf16.msra.mxu1 %v2317_v37 }
 0x21a   :  { %2327 = vmatprep.subr.bf16.mxu1 %v2580_v41 }
 0x21c   :  { %2045 = vmatmul.mubr.f32.vlgmr.msra.gmra.mrb[0].mxu1 %v610_v38 }
 0x21d   :  { %2047 = vmatprep.mubr.f32.mxu1 %v2964_v62  ;;  %2329 = vmatpush3.bf16.msra.mxu1 %v2328_v43  ;;  %v1018_v62 = vld [vmem:[%s3140_s18 + $0x60] sm:$0xff]  ;;  %s2582_s18 = smov [#allocation14]  }
 0x21e   :  { %2330 = vmatprep.subr.bf16.mxu1 %v2580_v41  ;;  %v2346_v0 = vpack.c.bf16 %v1019_v63, %v1018_v62  ;;  %v1509_v62 = vld [vmem:[%s3166_s6 + $0x18] sm:$0xff]  ;;  %s1629_s3 = sshll.u32 %s2582_s18, 4  ;;  %s1630_s3 = int_to_ptr.vmem [resolvable:$true] %s1629_s3 }
 0x21f   :  { %s2538_s5 = scalar_lea.vmem %s1630_s3, 512  ;;  %p2543_p1 = scmp.lt.s32.totalorder %s1630_s3, %s1630_s3 }
 0x220   :  { %2048 = vmatmul.mubr.f32.gmra.mrb[2].mxu1 %v612_v39  ;;  %p2539_p0 = scmp.ne.s32.totalorder %s1630_s3, %s2538_s5  ;;  %p2544_p2 = scmp.lt.s32.totalorder %s2538_s5, %s2538_s5 }
 0x221   :  { %2093 = vmatprep.mubr.msk.f32.mxu1 %vm2581_vm6, %v2579_v56  ;;  %2332 = vmatpush3.bf16.msra.mxu1 %v2331_v45 }
 0x222   :  { %2333 = vmatprep.subr.bf16.mxu1 %v2580_v41  ;;  %p2545_p3 = por %p2544_p2, %p2543_p1 }
 0x224   :  { %p2546_p4 = pnand %p2545_p3, %p2539_p0 }
 0x225   :  { %2335 = vmatpush3.bf16.msra.mxu1 %v2334_v49 }
 0x226   :  { %2336 = vmatprep.subr.bf16.mxu1 %v2580_v41 }
 0x229   :  { %2338 = vmatpush3.bf16.msra.mxu1 %v2337_v51 }
 0x22a   :  { %2339 = vmatprep.subr.bf16.mxu1 %v2580_v41 }
 0x22d   :  { %2341 = vmatpush3.bf16.msra.mxu1 %v2340_v58 }
 0x22e   :  { %2342 = vmatprep.subr.bf16.mxu1 %v2580_v41 }
 0x231   :  { %2344 = vmatpush3.bf16.msra.mxu1 %v2343_v61  ;;  %v1508_v61 = vld [vmem:[%s3166_s6 + $0x10] sm:$0xff] }
 0x232   :  { %2345 = vmatprep.subr.bf16.mxu1 %v2580_v41 }
 0x235   :  { %2347 = vmatpush3.bf16.msra.mxu1 %v2346_v0 }
 0x236   :  { %2348 = vmatprep.subr.bf16.mxu1 %v2580_v41 }
 0x239   :  { %2350 = vmatpush3.bf16.msra.mxu1 %v2349_v57 }
 0x2ef   :  { %v2046_v5 = vpop.f32.mrb[0].mxu1 }
 0x2f0   :  { %v3025_v7 = vadd.f32 %v2046_v5, %v1649_v4  ;;  %v897_v8 = vpop.f32.mrb[1].mxu1 }
 0x2f1   :  { %v3027_v10 = vadd.f32 %v1649_v4, %v897_v8 }
 0x2f3   :  { %v2322_v33 = vpack.c.bf16 %v3025_v7, %v3027_v10  ;;  %v2049_v11 = vpop.f32.mrb[2].mxu1 }
 0x2f4   :  { %v3031_v12 = vadd.f32 %v2049_v11, %v1649_v4  ;;  %v907_v13 = vpop.f32.mrb[3].mxu1 }
 0x2f5   :  { %v3033_v14 = vadd.f32 %v1649_v4, %v907_v13  ;;  %2323 = vmatpush3.bf16.msra.mxu0 %v2322_v33 }
 0x2f6   :  { %2324 = vmatprep.subr.bf16.mxu0 %v2580_v41 }
 0x2f7   :  { %v2325_v15 = vpack.c.bf16 %v3031_v12, %v3033_v14 }
 0x2f9   :  { %2326 = vmatpush3.bf16.msra.mxu0 %v2325_v15 }
 0x2fa   :  { %2096 = vmatprep.subr.mxu0 %v2579_v56 }
 0x2fc   :  { %2059 = vmatmul.mubr.msk.f32.vlgmr.msra.gmra.mrb[4].mxu0 %vm932_vm7, %v931_v16 }
 0x2fd   :  { %2098 = vmatprep.mubr.msk.f32.mxu0 %vm2581_vm6, %v2579_v56  ;;  %2097 = vmatpush3.msra.mxu0 %v1092_v19 }
 0x2fe   :  { %2101 = vmatprep.subr.mxu0 %v2579_v56 }
 0x3cf   :  { %v1002_v17 = vpop.f32.mrb[4].mxu0 }
 0x3d0   :  { %v2060_v18 = vpop.f32.mrb[5].mxu0  ;;  %2094 = vmatmul.mubr.f32.vlgmr.msra.gmra.mrb[4].mxu1 %v1002_v17 }
 0x4a3   :  { %v1088_v20 = vpop.f32.mrb[4].mxu1 }
 0x4a4   :  { %v2095_v21 = vpop.f32.mrb[5].mxu1  ;;  %2099 = vmatmul.mubr.msk.f32.vlgmr.msra.gmra.mrb[6].mxu0 %vm1100_vm8, %v1088_v20 }
 0x4a5   :  { %2103 = vmatprep.mubr.msk.f32.mxu0 %vm2581_vm6, %v2579_v56  ;;  %2102 = vmatpush3.msra.mxu0 %v1175_v22 }
 0x4a6   :  { %2106 = vmatprep.subr.mxu0 %v2579_v56 }
 0x577   :  { %v1170_v24 = vpop.f32.mrb[6].mxu0 }
 0x578   :  { %v1171_v25 = vadd.f32 %v1651_v23, %v1170_v24  ;;  %v2100_v27 = vpop.f32.mrb[7].mxu0 }
 0x57a   :  { %v1174_v26 = vmax.f32 %v1171_v25, 0.0 }
 0x57c   :  { %2104 = vmatmul.mubr.msk.f32.vlgmr.msra.gmra.mrb[8].mxu0 %vm1100_vm8, %v1174_v26 }
 0x57d   :  { %2108 = vmatprep.mubr.msk.f32.mxu0 %vm2581_vm6, %v2579_v56  ;;  %2107 = vmatpush3.msra.mxu0 %v1257_v28 }
 0x57e   :  { %2111 = vmatprep.subr.mxu0 %v2579_v56 }
 0x64f   :  { %v1252_v30 = vpop.f32.mrb[8].mxu0 }
 0x650   :  { %v1253_v31 = vadd.f32 %v1653_v29, %v1252_v30  ;;  %v2105_v32 = vpop.f32.mrb[9].mxu0 }
 0x652   :  { %v1256_v34 = vmax.f32 %v1253_v31, 0.0 }
 0x654   :  { %2109 = vmatmul.mubr.msk.f32.vlgmr.msra.gmra.mrb[10].mxu0 %vm1100_vm8, %v1256_v34 }
 0x655   :  { %2113 = vmatprep.mubr.msk.f32.mxu0 %vm2581_vm6, %v2579_v56  ;;  %2112 = vmatpush3.msra.mxu0 %v1339_v35 }
 0x656   :  { %2116 = vmatprep.subr.mxu0 %v2579_v56 }
 0x727   :  { %v1334_v37 = vpop.f32.mrb[10].mxu0 }
 0x728   :  { %v1335_v38 = vadd.f32 %v1655_v36, %v1334_v37  ;;  %v2110_v39 = vpop.f32.mrb[11].mxu0 }
 0x72a   :  { %v1338_v41 = vmax.f32 %v1335_v38, 0.0 }
 0x72c   :  { %2114 = vmatmul.mubr.msk.f32.vlgmr.msra.gmra.mrb[12].mxu0 %vm1100_vm8, %v1338_v41 }
 0x72d   :  { %2118 = vmatprep.mubr.msk.f32.mxu0 %vm2581_vm6, %v2579_v56  ;;  %v1432_v56 = vld [vmem:[%s3142_s20] sm:$0xff] }
 0x72e   :  { %2117 = vmatpush3.msra.mxu0 %v1432_v56 }
 0x7ff   :  { %v1416_v42 = vpop.f32.mrb[12].mxu0 }
 0x800   :  { %v1417_v6 = vadd.f32 %v1657_v2, %v1416_v42  ;;  %v2115_v43 = vpop.f32.mrb[13].mxu0 }
 0x802   :  { %v1421_v44 = vsel %vm1420_vm9, %v1417_v6, -inf }
 0x803   :  { %1422 = vmax.xlane.f32.xlu0 %v1421_v44 }
 0x890   :  { %v1423_v45 = vpop.xlane.xlu0 %1422 }
 0x891   :  { %v1424_v46 = vsub.f32 %v1417_v6, %v1423_v45 }
 0x893   :  { %v1425_v48 = vmul.f32 1.442695, %v1424_v46 }
 0x895   :  { %2380 = vpow2.f32 %v1425_v48 }
 0x89f   :  { %v2381_v49 = vpop.eup %2380 }
 0x8a0   :  { %v1427_v50 = vsel %vm1420_vm9, %v2381_v49, 0.0 }
 0x8a1   :  { %1428 = vadd.xlane.f32.xlu0 %v1427_v50 }
 0x92e   :  { %v1429_v47 = vpop.xlane.xlu0 %1428 }
 0x92f   :  { %2382 = vrcp.f32 %v1429_v47 }
 0x939   :  { %v2383_v51 = vpop.eup %2382 }
 0x93a   :  { %v1431_v52 = vmul.f32 %v2383_v51, %v2381_v49 }
 0x93c   :  { %2119 = vmatmul.mubr.msk.f32.vlgmr.msra.gmra.mrb[14].mxu0 %vm1100_vm8, %v1431_v52 }
 0x93d   :  { %2123 = vmatprep.mubr.msk.f32.mxu0 %vm1510_vm10, %v1506_v54 }
 0xa0f   :  { %v1502_v58 = vpop.f32.mrb[14].mxu0 }
 0xa10   :  { %v2120_v60 = vpop.f32.mrb[15].mxu0  ;;  %2121 = vmatprep.subr.msk.mxu0 %vm1523_vm11, %v1502_v58 }
 0xa11   :  { %2122 = vmatpush3.msk.msra.mxu0 %vm1523_vm11, %v1502_v58 }
 0xa12   :  { %2124 = vmatmul.mubr.msk.f32.vlgmr.msra.gmra.mrb[16].mxu0 %vm1510_vm10, %v1507_v59 }
 0xa13   :  { %2126 = vmatprep.mubr.msk.f32.mxu0 %vm1510_vm10, %v1508_v61 }
 0xa16   :  { %2127 = vmatmul.mubr.msk.f32.gmra.mrb[18].mxu0 %vm1510_vm10, %v1509_v62 }
 0xae5   :  { %v2125_v63 = vpop.f32.mrb[16].mxu0 }
 0xae6   :  { %v1613_v0 = vmul.f32 %v2125_v63, %v3025_v7  ;;  %v1593_v1 = vpop.f32.mrb[17].mxu0 }
 0xae7   :  { %v1612_v3 = vmul.f32 %v1593_v1, %v3027_v10 }
 0xae8   :  { %v1617_v57 = vadd.f32 %v1613_v0, %v2845_v53 }
 0xae9   :  { %v1616_v4 = vadd.f32 %v1612_v3, %v2816_v9  ;;  %v2128_v5 = vpop.f32.mrb[18].mxu0 }
 0xaea   :  { %1621 = vst [vmem:[#allocation14 + $0x8] sm:$0xff] %v1617_v57  ;;  %v1615_v8 = vmul.f32 %v2128_v5, %v3031_v12  ;;  %v1603_v33 = vpop.f32.mrb[19].mxu0 }
 0xaeb   :  { %1620 = vst [vmem:[#allocation14] sm:$0xff] %v1616_v4  ;;  %v1614_v11 = vmul.f32 %v1603_v33, %v3033_v14 }
 0xaec   :  { %v1619_v13 = vadd.f32 %v1615_v8, %v2830_v40 }
 0xaed   :  { %v1618_v7 = vadd.f32 %v1614_v11, %v2850_v55 }
 0xaee   :  { %1623 = vst [vmem:[#allocation14 + $0x18] sm:$0xff] %v1619_v13 }
 0xaef   :  { %1622 = vst [vmem:[#allocation14 + $0x10] sm:$0xff] %v1618_v7 }
 0xaf0   :  { %2549 = shalt.err (!%p2546_p4)
}
 0xaf1   :  { %s3167_s19 = sld [smem:[#allocation27_spill]] }
 0xaf7   :  { %s2550_s22 = scalar_lea.hbm %s3167_s19, 512 }
 0xaf8   :  { %p2551_p5 = scmp.ne.s32.totalorder %s3167_s19, %s2550_s22  ;;  %p2554_p6 = scmp.lt.u32.totalorder %s2550_s22, %s3167_s19 }
 0xafa   :  { %p2556_p7 = pnand %p2554_p6, %p2551_p5 }
 0xafc   :  { %2559 = shalt.err (!%p2556_p7)
}
 0xafd   :  { %1635 = dma.vmem_to_hbm [thread:$0]  %s1630_s3, 512, %s3167_s19, [#allocation4], %s2572_s1, %s2572_s1, %s2573_s24  }
 0xafe   :  { %2568 = dma.done.wait [#allocation4], 512  }
 0xaff   :  { %2569 = vsyncadd [#allocation4], 4294966784 }
 0xb00   :  { %1639 = vsyncpa [#allocation3], 1 }
 0xb01   :  { %1640 = vsyncpa [#allocation6], 1 }
 0xb02   :  { %1641 = vsyncpa [#allocation9], 1 }
 0xb03   :  { %1642 = vsyncpa [#allocation12], 1 }
 0xb04   :  { %1643 = vsyncpa [#allocation4], 1 }

</bundles_post_ra>
